<compile_context>
chip_gen: v7x
topology: tpu7x:2x2x1
jax: 0.10.0
libtpu: 0.0.40
codegen_flags: <defaults>
</compile_context>

<pallas_src>
import functools
import math

import jax
import jax.numpy as jnp
import numpy as np
from jax.experimental import pallas as pl
from jax.experimental.pallas import tpu as pltpu

_EPS = 1e-5


# ----------------------------- host-side constants -----------------------------

@functools.lru_cache(maxsize=None)
def _conv_tap_setup(k, H, W, N):
    """Flattened-lane shifts and border-validity masks (tiled over the batch)
    for a kxk 'same' conv (stride 1) on HxW images stored on a length-N*H*W
    lane axis ordered (n, h, w)."""
    p = k // 2
    hw = H * W
    h_idx = np.arange(hw) // W
    w_idx = np.arange(hw) % W
    shifts = []
    masks = np.zeros((k * k, hw), np.float32)
    t = 0
    for dh in range(k):
        for dw in range(k):
            oh, ow = dh - p, dw - p
            shifts.append(oh * W + ow)
            valid = ((h_idx + oh >= 0) & (h_idx + oh < H) &
                     (w_idx + ow >= 0) & (w_idx + ow < W))
            masks[t] = valid.astype(np.float32)
            t += 1
    # Tile per-image masks over the batch; they also zero any cross-image
    # bleed introduced by rolling the whole N*H*W lane axis.
    return tuple(shifts), np.tile(masks, (1, N))


@functools.lru_cache(maxsize=None)
def _pool_matrix(mode, N, H, W):
    """[L, L/4] matrix so `slab @ P` performs the 2x2 pool on the (n,h,w) lane
    axis.  avg: 0.25 at the four window taps.  max: 0/1 selection of each
    window's top-left corner (applied after in-kernel roll+max combines)."""
    Ho, Wo = H // 2, W // 2
    L, Lp = N * H * W, N * Ho * Wo
    P = np.zeros((L, Lp), np.float32)
    for n in range(N):
        for ho in range(Ho):
            for wo in range(Wo):
                m = n * Ho * Wo + ho * Wo + wo
                if mode == "avg":
                    for dh in range(2):
                        for dw in range(2):
                            P[n * H * W + (2 * ho + dh) * W + (2 * wo + dw), m] = 0.25
                else:  # max: select the top-left corner of the window
                    P[n * H * W + (2 * ho) * W + (2 * wo), m] = 1.0
    return P


# ----------------------------- Pallas kernels -----------------------------

def _conv_stage_kernel(*refs, shifts, cin, apply_relu, has_res, pool_mode, w_img):
    """Fused: kxk 'same' conv (single batched matmul on a rolled+masked slab)
    + BatchNorm(batch stats) + optional residual + optional ReLU + optional
    fused 2x2 max/avg pool.  Whole problem resident in VMEM."""
    it = iter(refs)
    x_ref = next(it)          # [Cin, L]         L = N*H*W
    w_ref = next(it)          # [Cout, k*k*Cin]
    m_ref = next(it)          # [k*k, L]
    g_ref = next(it)          # [Cout, 1]
    b_ref = next(it)          # [Cout, 1]
    r_ref = next(it) if has_res else None            # [Cout, L]
    p_ref = next(it) if pool_mode is not None else None   # [L, L/4]
    o_ref = next(it)          # [Cout, L] or [Cout, L/4]
    slab_ref = next(it)       # VMEM scratch [k*k*Cin, L]

    x = x_ref[...]
    masks = m_ref[...]
    L = x.shape[1]

    # ---- build the shifted+masked slab: one XLU roll + VPU mask per tap ----
    for t, s in enumerate(shifts):
        xs = x if s == 0 else pltpu.roll(x, (-s) % L, axis=1)   # out[:,j] = x[:,j+s]
        slab_ref[pl.ds(t * cin, cin), :] = xs * masks[t:t + 1, :]

    # ---- single MXU matmul for the whole batch ----
    y = jnp.dot(w_ref[...], slab_ref[...],
                preferred_element_type=jnp.float32)             # [Cout, L]

    # ---- BatchNorm: biased batch statistics over N*H*W per channel ----
    inv = 1.0 / float(L)
    mean = jnp.sum(y, axis=1, keepdims=True) * inv
    d = y - mean
    var = jnp.sum(d * d, axis=1, keepdims=True) * inv
    y = d * (jax.lax.rsqrt(var + _EPS) * g_ref[...]) + b_ref[...]

    # ---- residual add / ReLU ----
    if has_res:
        y = y + r_ref[...]
    if apply_relu:
        y = jnp.maximum(y, 0.0)

    # ---- fused 2x2 pool (lane-dense output) ----
    if pool_mode == "max":
        y = jnp.maximum(y, pltpu.roll(y, L - 1, axis=1))        # w-pair combine
        y = jnp.maximum(y, pltpu.roll(y, L - w_img, axis=1))    # h-pair combine
        o_ref[...] = jnp.dot(y, p_ref[...], preferred_element_type=jnp.float32)
    elif pool_mode == "avg":
        o_ref[...] = jnp.dot(y, p_ref[...], preferred_element_type=jnp.float32)
    else:
        o_ref[...] = y


def _pool_kernel(x_ref, p_ref, o_ref, *, mode, w_img):
    """Standalone lane-dense 2x2 pool on a [C, N*H*W] slab (used only when a
    pool is not preceded by a conv/res stage)."""
    x = x_ref[...]
    L = x.shape[1]
    if mode == "max":
        x = jnp.maximum(x, pltpu.roll(x, L - 1, axis=1))
        x = jnp.maximum(x, pltpu.roll(x, L - w_img, axis=1))
    o_ref[...] = jnp.dot(x, p_ref[...], preferred_element_type=jnp.float32)


def _linear_kernel(x_ref, w_ref, b_ref, o_ref):
    y = jnp.dot(x_ref[...], w_ref[...],
                preferred_element_type=jnp.float32) + b_ref[...]
    o_ref[...] = jax.nn.sigmoid(y)


# ----------------------------- kernel wrappers -----------------------------

def conv_stage(x_slab, shape, w_oihw, gamma, beta, *, apply_relu,
               residual=None, pool=None):
    """Fused kxk 'same' conv (stride 1; bias folded out by BN) + BatchNorm
    (+ residual) (+ ReLU) (+ fused 2x2 pool).  x_slab/residual/output are
    [C, N*H*W] slabs; `shape` is the logical (N, C, H, W)."""
    N, Cin, H, W = shape
    Cout, Cin2, kh, kw = w_oihw.shape
    assert Cin == Cin2 and kh == kw and kh % 2 == 1
    L = N * H * W
    shifts, masks_np = _conv_tap_setup(kh, H, W, N)
    # Tap-major columns to match the slab row order (tiny; folded under jit).
    w_mat = jnp.transpose(w_oihw, (0, 2, 3, 1)).reshape(Cout, kh * kw * Cin)

    args = [x_slab, w_mat, jnp.asarray(masks_np),
            gamma.reshape(Cout, 1), beta.reshape(Cout, 1)]
    if residual is not None:
        args.append(residual)
    if pool is not None:
        args.append(jnp.asarray(_pool_matrix(pool, N, H, W)))
        Ho, Wo = H // 2, W // 2
        out_cols, out_shape = N * Ho * Wo, (N, Cout, Ho, Wo)
    else:
        out_cols, out_shape = L, (N, Cout, H, W)

    out = pl.pallas_call(
        functools.partial(_conv_stage_kernel, shifts=shifts, cin=Cin,
                          apply_relu=apply_relu, has_res=residual is not None,
                          pool_mode=pool, w_img=W),
        out_shape=jax.ShapeDtypeStruct((Cout, out_cols), jnp.float32),
        scratch_shapes=[pltpu.VMEM((kh * kw * Cin, L), jnp.float32)],
    )(*args)
    return out, out_shape


def pool_stage(x_slab, shape, mode):
    N, C, H, W = shape
    Ho, Wo = H // 2, W // 2
    out = pl.pallas_call(
        functools.partial(_pool_kernel, mode=mode, w_img=W),
        out_shape=jax.ShapeDtypeStruct((C, N * Ho * Wo), jnp.float32),
    )(x_slab, jnp.asarray(_pool_matrix(mode, N, H, W)))
    return out, (N, C, Ho, Wo)


def linear_sigmoid(x_flat, wl, bl):
    N, _F = x_flat.shape
    K = wl.shape[1]
    return pl.pallas_call(
        _linear_kernel,
        out_shape=jax.ShapeDtypeStruct((N, K), jnp.float32),
    )(x_flat, wl, bl.reshape(1, K))


# ----------------------------- parameter setup -----------------------------

def _init_conv(key, cin, cout, k):
    k1, k2 = jax.random.split(key)
    bound = 1.0 / math.sqrt(cin * k * k)
    w = jax.random.uniform(k1, (cout, cin, k, k), jnp.float32, -bound, bound)
    b = jax.random.uniform(k2, (cout,), jnp.float32, -bound, bound)
    return w, b


def build_params(decoded_chromosome, channel, n_class, input_size, key):
    size, ch = input_size, channel
    params = []
    for layer in decoded_chromosome:
        layer = layer[0]
        name = layer[0]
        if name in ("max", "avg"):
            size = size // 2
            params.append(("pool", name))
        elif name == "conv":
            cout, k = layer[1], layer[2]
            key, sub = jax.random.split(key)
            w, b = _init_conv(sub, ch, cout, k)
            params.append(("conv", w, b, jnp.ones((cout,), jnp.float32),
                           jnp.zeros((cout,), jnp.float32)))
            ch = cout
        elif name == "res":
            cout, k = layer[1], layer[2]
            key, s1, s2, s3 = jax.random.split(key, 4)
            w1, b1 = _init_conv(s1, ch, cout, k)
            w2, b2 = _init_conv(s2, cout, cout, k)
            gamma = jnp.ones((cout,), jnp.float32)
            beta = jnp.zeros((cout,), jnp.float32)
            fix = None
            if ch != cout:
                wf, bf = _init_conv(s3, ch, cout, 3)
                fix = (wf, bf, jnp.ones((cout,), jnp.float32),
                       jnp.zeros((cout,), jnp.float32))
            params.append(("res", w1, b1, w2, b2, gamma, beta, fix))
            ch = cout
        if size < 1:
            raise ValueError("Bad Network")
    key, sub1, sub2 = jax.random.split(key, 3)
    in_features = ch * size * size
    bound = 1.0 / math.sqrt(in_features)
    wl = jax.random.uniform(sub1, (in_features, n_class), jnp.float32, -bound, bound)
    bl = jax.random.uniform(sub2, (n_class,), jnp.float32, -bound, bound)
    params.append(("linear", wl, bl))
    return params


# ----------------------------- forward pass -----------------------------

def convnet_forward(params, x_nchw):
    N, C, H, W = x_nchw.shape
    # One tiny host-side relayout to the lane-dense [C, N*H*W] slab.
    x = jnp.transpose(x_nchw, (1, 0, 2, 3)).reshape(C, N * H * W)
    shape = (N, C, H, W)
    i = 0
    while i < len(params):
        p = params[i]
        kind = p[0]
        fused_pool = None
        if kind in ("conv", "res") and i + 1 < len(params) and params[i + 1][0] == "pool":
            fused_pool = params[i + 1][1]           # fuse the pool into this stage

        if kind == "pool":
            x, shape = pool_stage(x, shape, p[1])
            i += 1
        elif kind == "conv":
            _, w, _b, gamma, beta = p               # conv bias cancelled by BN
            x, shape = conv_stage(x, shape, w, gamma, beta,
                                  apply_relu=True, pool=fused_pool)
            i += 2 if fused_pool is not None else 1
        elif kind == "res":
            _, w1, _b1, w2, _b2, gamma, beta, fix = p
            if fix is None:
                residual = x
            else:
                wf, _bf, gf, btf = fix
                residual, _ = conv_stage(x, shape, wf, gf, btf, apply_relu=False)
            h, hshape = conv_stage(x, shape, w1, gamma, beta, apply_relu=True)
            x, shape = conv_stage(h, hshape, w2, gamma, beta, apply_relu=True,
                                  residual=residual, pool=fused_pool)
            i += 2 if fused_pool is not None else 1
        elif kind == "linear":
            _, wl, bl = p
            Nn, Cc, Hh, Ww = shape
            # NCHW flatten (torch's output.view(N, -1)); ~1 KiB host transpose.
            xf = x.reshape(Cc, Nn, Hh * Ww).transpose(1, 0, 2).reshape(Nn, Cc * Hh * Ww)
            return linear_sigmoid(xf, wl, bl)
        else:
            raise ValueError(kind)
    raise ValueError("chromosome has no linear head")


# ----------------------------- pure-JAX reference -----------------------------

def reference_forward(params, x_nchw):
    def conv(x, w, b):
        pad = w.shape[2] // 2
        y = jax.lax.conv_general_dilated(
            x, w, (1, 1), ((pad, pad), (pad, pad)),
            dimension_numbers=("NCHW", "OIHW", "NCHW"))
        return y + b[None, :, None, None]

    def bn(x, g, bt):
        m = jnp.mean(x, axis=(0, 2, 3), keepdims=True)
        v = jnp.mean((x - m) ** 2, axis=(0, 2, 3), keepdims=True)
        return (x - m) / jnp.sqrt(v + _EPS) * g[None, :, None, None] + bt[None, :, None, None]

    x = x_nchw
    for p in params:
        kind = p[0]
        if kind == "pool":
            N, C, H, W = x.shape
            xr = x.reshape(N, C, H // 2, 2, W // 2, 2)
            x = xr.max(axis=(3, 5)) if p[1] == "max" else xr.mean(axis=(3, 5))
        elif kind == "conv":
            _, w, b, g, bt = p
            x = jax.nn.relu(bn(conv(x, w, b), g, bt))
        elif kind == "res":
            _, w1, b1, w2, b2, g, bt, fix = p
            res = x
            h = jax.nn.relu(bn(conv(x, w1, b1), g, bt))
            h = bn(conv(h, w2, b2), g, bt)
            if fix is not None:
                wf, bf, gf, btf = fix
                res = bn(conv(res, wf, bf), gf, btf)
            x = jax.nn.relu(h + res)
        elif kind == "linear":
            _, wl, bl = p
            return jax.nn.sigmoid(x.reshape(x.shape[0], -1) @ wl + bl)
    return x


# ----------------------------- main -----------------------------

if __name__ == "__main__":
    decoded_chromosome = [
        [("conv", 8, 3)],
        [("max",)],
        [("res", 8, 3)],
        [("avg",)],
    ]
    batch, channel, n_class, input_size = 2, 4, 10, 16

    key = jax.random.PRNGKey(0)
    pkey, xkey = jax.random.split(key)
    params = build_params(decoded_chromosome, channel, n_class, input_size, pkey)
    x = jax.random.normal(xkey, (batch, channel, input_size, input_size), jnp.float32)

    fwd = jax.jit(lambda inp: convnet_forward(params, inp))
    out = jax.block_until_ready(fwd(x))

    ref = reference_forward(params, x)
    assert out.shape == (batch, n_class), out.shape
    err = float(jnp.max(jnp.abs(out - ref)))
    assert err < 1e-4, f"mismatch vs reference: {err}"
    print("KERNEL_OK")
</pallas_src>

<mosaic_0001>
module attributes {stable_mosaic.version = 11 : i64} {
  func.func @_conv_stage_kernel(%arg0: memref<4x512xf32, #tpu.memory_space<vmem>>, %arg1: memref<8x36xf32, #tpu.memory_space<vmem>>, %arg2: memref<9x512xf32, #tpu.memory_space<vmem>>, %arg3: memref<8x1xf32, #tpu.memory_space<vmem>>, %arg4: memref<8x1xf32, #tpu.memory_space<vmem>>, %arg5: memref<512x128xf32, #tpu.memory_space<vmem>>, %arg6: memref<8x128xf32, #tpu.memory_space<vmem>>, %arg7: memref<36x512xf32, #tpu.memory_space<vmem>>) attributes {dimension_semantics = [], scalar_prefetch = 0 : i64, scratch_operands = 1 : i64, tpu.core_type = #tpu.core_type<tc>} {
    %c0 = arith.constant 0 : index
    %c0_0 = arith.constant 0 : index
    %0 = vector.load %arg0[%c0, %c0_0] : memref<4x512xf32, #tpu.memory_space<vmem>>, vector<4x512xf32>
    %c0_1 = arith.constant 0 : index
    %c0_2 = arith.constant 0 : index
    %1 = vector.load %arg2[%c0_1, %c0_2] : memref<9x512xf32, #tpu.memory_space<vmem>>, vector<9x512xf32>
    %c17_i32 = arith.constant 17 : i32
    %2 = tpu.dynamic_rotate %0 by %c17_i32 dim 1 : vector<4x512xf32>, i32 -> vector<4x512xf32>
    %3 = vector.extract_strided_slice %1 {offsets = [0, 0], sizes = [1, 512], strides = [1, 1]} : vector<9x512xf32> to vector<1x512xf32>
    %4 = vector.broadcast %3 : vector<1x512xf32> to vector<4x512xf32>
    %5 = arith.mulf %2, %4 : vector<4x512xf32>
    %c0_3 = arith.constant 0 : index
    %c0_4 = arith.constant 0 : index
    %6 = vector.load %arg7[%c0_3, %c0_4] : memref<36x512xf32, #tpu.memory_space<vmem>>, vector<4x512xf32>
    tpu.vector_store %arg7[%c0_3, %c0_4], %5 {strides = array<i32>} : memref<36x512xf32, #tpu.memory_space<vmem>>, vector<4x512xf32>,
    %c16_i32 = arith.constant 16 : i32
    %7 = tpu.dynamic_rotate %0 by %c16_i32 dim 1 : vector<4x512xf32>, i32 -> vector<4x512xf32>
    %8 = vector.extract_strided_slice %1 {offsets = [1, 0], sizes = [1, 512], strides = [1, 1]} : vector<9x512xf32> to vector<1x512xf32>
    %9 = vector.broadcast %8 : vector<1x512xf32> to vector<4x512xf32>
    %10 = arith.mulf %7, %9 : vector<4x512xf32>
    %c4 = arith.constant 4 : index
    %c0_5 = arith.constant 0 : index
    %11 = vector.load %arg7[%c4, %c0_5] : memref<36x512xf32, #tpu.memory_space<vmem>>, vector<4x512xf32>
    tpu.vector_store %arg7[%c4, %c0_5], %10 {strides = array<i32>} : memref<36x512xf32, #tpu.memory_space<vmem>>, vector<4x512xf32>,
    %c15_i32 = arith.constant 15 : i32
    %12 = tpu.dynamic_rotate %0 by %c15_i32 dim 1 : vector<4x512xf32>, i32 -> vector<4x512xf32>
    %13 = vector.extract_strided_slice %1 {offsets = [2, 0], sizes = [1, 512], strides = [1, 1]} : vector<9x512xf32> to vector<1x512xf32>
    %14 = vector.broadcast %13 : vector<1x512xf32> to vector<4x512xf32>
    %15 = arith.mulf %12, %14 : vector<4x512xf32>
    %c8 = arith.constant 8 : index
    %c0_6 = arith.constant 0 : index
    %16 = vector.load %arg7[%c8, %c0_6] : memref<36x512xf32, #tpu.memory_space<vmem>>, vector<4x512xf32>
    tpu.vector_store %arg7[%c8, %c0_6], %15 {strides = array<i32>} : memref<36x512xf32, #tpu.memory_space<vmem>>, vector<4x512xf32>,
    %c1_i32 = arith.constant 1 : i32
    %17 = tpu.dynamic_rotate %0 by %c1_i32 dim 1 : vector<4x512xf32>, i32 -> vector<4x512xf32>
    %18 = vector.extract_strided_slice %1 {offsets = [3, 0], sizes = [1, 512], strides = [1, 1]} : vector<9x512xf32> to vector<1x512xf32>
    %19 = vector.broadcast %18 : vector<1x512xf32> to vector<4x512xf32>
    %20 = arith.mulf %17, %19 : vector<4x512xf32>
    %c12 = arith.constant 12 : index
    %c0_7 = arith.constant 0 : index
    %21 = vector.load %arg7[%c12, %c0_7] : memref<36x512xf32, #tpu.memory_space<vmem>>, vector<4x512xf32>
    tpu.vector_store %arg7[%c12, %c0_7], %20 {strides = array<i32>} : memref<36x512xf32, #tpu.memory_space<vmem>>, vector<4x512xf32>,
    %22 = vector.extract_strided_slice %1 {offsets = [4, 0], sizes = [1, 512], strides = [1, 1]} : vector<9x512xf32> to vector<1x512xf32>
    %23 = vector.broadcast %22 : vector<1x512xf32> to vector<4x512xf32>
    %24 = arith.mulf %0, %23 : vector<4x512xf32>
    %c16 = arith.constant 16 : index
    %c0_8 = arith.constant 0 : index
    %25 = vector.load %arg7[%c16, %c0_8] : memref<36x512xf32, #tpu.memory_space<vmem>>, vector<4x512xf32>
    tpu.vector_store %arg7[%c16, %c0_8], %24 {strides = array<i32>} : memref<36x512xf32, #tpu.memory_space<vmem>>, vector<4x512xf32>,
    %c511_i32 = arith.constant 511 : i32
    %26 = tpu.dynamic_rotate %0 by %c511_i32 dim 1 : vector<4x512xf32>, i32 -> vector<4x512xf32>
    %27 = vector.extract_strided_slice %1 {offsets = [5, 0], sizes = [1, 512], strides = [1, 1]} : vector<9x512xf32> to vector<1x512xf32>
    %28 = vector.broadcast %27 : vector<1x512xf32> to vector<4x512xf32>
    %29 = arith.mulf %26, %28 : vector<4x512xf32>
    %c20 = arith.constant 20 : index
    %c0_9 = arith.constant 0 : index
    %30 = vector.load %arg7[%c20, %c0_9] : memref<36x512xf32, #tpu.memory_space<vmem>>, vector<4x512xf32>
    tpu.vector_store %arg7[%c20, %c0_9], %29 {strides = array<i32>} : memref<36x512xf32, #tpu.memory_space<vmem>>, vector<4x512xf32>,
    %c497_i32 = arith.constant 497 : i32
    %31 = tpu.dynamic_rotate %0 by %c497_i32 dim 1 : vector<4x512xf32>, i32 -> vector<4x512xf32>
    %32 = vector.extract_strided_slice %1 {offsets = [6, 0], sizes = [1, 512], strides = [1, 1]} : vector<9x512xf32> to vector<1x512xf32>
    %33 = vector.broadcast %32 : vector<1x512xf32> to vector<4x512xf32>
    %34 = arith.mulf %31, %33 : vector<4x512xf32>
    %c24 = arith.constant 24 : index
    %c0_10 = arith.constant 0 : index
    %35 = vector.load %arg7[%c24, %c0_10] : memref<36x512xf32, #tpu.memory_space<vmem>>, vector<4x512xf32>
    tpu.vector_store %arg7[%c24, %c0_10], %34 {strides = array<i32>} : memref<36x512xf32, #tpu.memory_space<vmem>>, vector<4x512xf32>,
    %c496_i32 = arith.constant 496 : i32
    %36 = tpu.dynamic_rotate %0 by %c496_i32 dim 1 : vector<4x512xf32>, i32 -> vector<4x512xf32>
    %37 = vector.extract_strided_slice %1 {offsets = [7, 0], sizes = [1, 512], strides = [1, 1]} : vector<9x512xf32> to vector<1x512xf32>
    %38 = vector.broadcast %37 : vector<1x512xf32> to vector<4x512xf32>
    %39 = arith.mulf %36, %38 : vector<4x512xf32>
    %c28 = arith.constant 28 : index
    %c0_11 = arith.constant 0 : index
    %40 = vector.load %arg7[%c28, %c0_11] : memref<36x512xf32, #tpu.memory_space<vmem>>, vector<4x512xf32>
    tpu.vector_store %arg7[%c28, %c0_11], %39 {strides = array<i32>} : memref<36x512xf32, #tpu.memory_space<vmem>>, vector<4x512xf32>,
    %c495_i32 = arith.constant 495 : i32
    %41 = tpu.dynamic_rotate %0 by %c495_i32 dim 1 : vector<4x512xf32>, i32 -> vector<4x512xf32>
    %42 = vector.extract_strided_slice %1 {offsets = [8, 0], sizes = [1, 512], strides = [1, 1]} : vector<9x512xf32> to vector<1x512xf32>
    %43 = vector.broadcast %42 : vector<1x512xf32> to vector<4x512xf32>
    %44 = arith.mulf %41, %43 : vector<4x512xf32>
    %c32 = arith.constant 32 : index
    %c0_12 = arith.constant 0 : index
    %45 = vector.load %arg7[%c32, %c0_12] : memref<36x512xf32, #tpu.memory_space<vmem>>, vector<4x512xf32>
    tpu.vector_store %arg7[%c32, %c0_12], %44 {strides = array<i32>} : memref<36x512xf32, #tpu.memory_space<vmem>>, vector<4x512xf32>,
    %c0_13 = arith.constant 0 : index
    %c0_14 = arith.constant 0 : index
    %46 = vector.load %arg1[%c0_13, %c0_14] : memref<8x36xf32, #tpu.memory_space<vmem>>, vector<8x36xf32>
    %c0_15 = arith.constant 0 : index
    %c0_16 = arith.constant 0 : index
    %47 = vector.load %arg7[%c0_15, %c0_16] : memref<36x512xf32, #tpu.memory_space<vmem>>, vector<36x512xf32>
    %cst = arith.constant dense<0.000000e+00> : vector<8x512xf32>
    %48 = tpu.matmul %46, %47, %cst {dimension_numbers = #tpu.dot_dimension_numbers<[1], [0], [0], [1], [0, 0, 1, 1], [], []>} : vector<8x36xf32>, vector<36x512xf32>, vector<8x512xf32> -> vector<8x512xf32>
    %cst_17 = arith.constant dense<0.000000e+00> : vector<8xf32>
    %49 = vector.multi_reduction <add>, %48, %cst_17 [1] : vector<8x512xf32> to vector<8xf32>
    %50 = vector.shape_cast %49 : vector<8xf32> to vector<8x1xf32>
    %cst_18 = arith.constant 0.001953125 : f32
    %51 = vector.broadcast %cst_18 : f32 to vector<8x1xf32>
    %52 = arith.mulf %50, %51 : vector<8x1xf32>
    %53 = vector.broadcast %52 : vector<8x1xf32> to vector<8x512xf32>
    %54 = arith.subf %48, %53 : vector<8x512xf32>
    %55 = arith.mulf %54, %54 : vector<8x512xf32>
    %cst_19 = arith.constant dense<0.000000e+00> : vector<8xf32>
    %56 = vector.multi_reduction <add>, %55, %cst_19 [1] : vector<8x512xf32> to vector<8xf32>
    %57 = vector.shape_cast %56 : vector<8xf32> to vector<8x1xf32>
    %cst_20 = arith.constant 0.001953125 : f32
    %58 = vector.broadcast %cst_20 : f32 to vector<8x1xf32>
    %59 = arith.mulf %57, %58 : vector<8x1xf32>
    %cst_21 = arith.constant 9.99999974E-6 : f32
    %60 = vector.broadcast %cst_21 : f32 to vector<8x1xf32>
    %61 = arith.addf %59, %60 : vector<8x1xf32>
    %62 = math.rsqrt %61 : vector<8x1xf32>
    %c0_22 = arith.constant 0 : index
    %c0_23 = arith.constant 0 : index
    %63 = vector.load %arg3[%c0_22, %c0_23] : memref<8x1xf32, #tpu.memory_space<vmem>>, vector<8x1xf32>
    %64 = arith.mulf %62, %63 : vector<8x1xf32>
    %65 = vector.broadcast %64 : vector<8x1xf32> to vector<8x512xf32>
    %66 = arith.mulf %54, %65 : vector<8x512xf32>
    %c0_24 = arith.constant 0 : index
    %c0_25 = arith.constant 0 : index
    %67 = vector.load %arg4[%c0_24, %c0_25] : memref<8x1xf32, #tpu.memory_space<vmem>>, vector<8x1xf32>
    %68 = vector.broadcast %67 : vector<8x1xf32> to vector<8x512xf32>
    %69 = arith.addf %66, %68 : vector<8x512xf32>
    %cst_26 = arith.constant 0.000000e+00 : f32
    %70 = vector.broadcast %cst_26 : f32 to vector<8x512xf32>
    %71 = arith.maximumf %69, %70 : vector<8x512xf32>
    %c511_i32_27 = arith.constant 511 : i32
    %72 = tpu.dynamic_rotate %71 by %c511_i32_27 dim 1 : vector<8x512xf32>, i32 -> vector<8x512xf32>
    %73 = arith.maximumf %71, %72 : vector<8x512xf32>
    %c496_i32_28 = arith.constant 496 : i32
    %74 = tpu.dynamic_rotate %73 by %c496_i32_28 dim 1 : vector<8x512xf32>, i32 -> vector<8x512xf32>
    %75 = arith.maximumf %73, %74 : vector<8x512xf32>
    %c0_29 = arith.constant 0 : index
    %c0_30 = arith.constant 0 : index
    %76 = vector.load %arg5[%c0_29, %c0_30] : memref<512x128xf32, #tpu.memory_space<vmem>>, vector<512x128xf32>
    %cst_31 = arith.constant dense<0.000000e+00> : vector<8x128xf32>
    %77 = tpu.matmul %75, %76, %cst_31 {dimension_numbers = #tpu.dot_dimension_numbers<[1], [0], [0], [1], [0, 0, 1, 1], [], []>} : vector<8x512xf32>, vector<512x128xf32>, vector<8x128xf32> -> vector<8x128xf32>
    %c0_32 = arith.constant 0 : index
    %c0_33 = arith.constant 0 : index
    %78 = vector.load %arg6[%c0_32, %c0_33] : memref<8x128xf32, #tpu.memory_space<vmem>>, vector<8x128xf32>
    tpu.vector_store %arg6[%c0_32, %c0_33], %77 {strides = array<i32>} : memref<8x128xf32, #tpu.memory_space<vmem>>, vector<8x128xf32>,
    return
  }
}

module attributes {stable_mosaic.version = 11 : i64} {
  func.func @_conv_stage_kernel(%arg0: memref<8x128xf32, #tpu.memory_space<vmem>>, %arg1: memref<8x72xf32, #tpu.memory_space<vmem>>, %arg2: memref<9x128xf32, #tpu.memory_space<vmem>>, %arg3: memref<8x1xf32, #tpu.memory_space<vmem>>, %arg4: memref<8x1xf32, #tpu.memory_space<vmem>>, %arg5: memref<8x128xf32, #tpu.memory_space<vmem>>, %arg6: memref<72x128xf32, #tpu.memory_space<vmem>>) attributes {dimension_semantics = [], scalar_prefetch = 0 : i64, scratch_operands = 1 : i64, tpu.core_type = #tpu.core_type<tc>} {
    %c0 = arith.constant 0 : index
    %c0_0 = arith.constant 0 : index
    %0 = vector.load %arg0[%c0, %c0_0] : memref<8x128xf32, #tpu.memory_space<vmem>>, vector<8x128xf32>
    %c0_1 = arith.constant 0 : index
    %c0_2 = arith.constant 0 : index
    %1 = vector.load %arg2[%c0_1, %c0_2] : memref<9x128xf32, #tpu.memory_space<vmem>>, vector<9x128xf32>
    %c9_i32 = arith.constant 9 : i32
    %2 = tpu.dynamic_rotate %0 by %c9_i32 dim 1 : vector<8x128xf32>, i32 -> vector<8x128xf32>
    %3 = vector.extract_strided_slice %1 {offsets = [0, 0], sizes = [1, 128], strides = [1, 1]} : vector<9x128xf32> to vector<1x128xf32>
    %4 = vector.broadcast %3 : vector<1x128xf32> to vector<8x128xf32>
    %5 = arith.mulf %2, %4 : vector<8x128xf32>
    %c0_3 = arith.constant 0 : index
    %c0_4 = arith.constant 0 : index
    %6 = vector.load %arg6[%c0_3, %c0_4] : memref<72x128xf32, #tpu.memory_space<vmem>>, vector<8x128xf32>
    tpu.vector_store %arg6[%c0_3, %c0_4], %5 {strides = array<i32>} : memref<72x128xf32, #tpu.memory_space<vmem>>, vector<8x128xf32>,
    %c8_i32 = arith.constant 8 : i32
    %7 = tpu.dynamic_rotate %0 by %c8_i32 dim 1 : vector<8x128xf32>, i32 -> vector<8x128xf32>
    %8 = vector.extract_strided_slice %1 {offsets = [1, 0], sizes = [1, 128], strides = [1, 1]} : vector<9x128xf32> to vector<1x128xf32>
    %9 = vector.broadcast %8 : vector<1x128xf32> to vector<8x128xf32>
    %10 = arith.mulf %7, %9 : vector<8x128xf32>
    %c8 = arith.constant 8 : index
    %c0_5 = arith.constant 0 : index
    %11 = vector.load %arg6[%c8, %c0_5] : memref<72x128xf32, #tpu.memory_space<vmem>>, vector<8x128xf32>
    tpu.vector_store %arg6[%c8, %c0_5], %10 {strides = array<i32>} : memref<72x128xf32, #tpu.memory_space<vmem>>, vector<8x128xf32>,
    %c7_i32 = arith.constant 7 : i32
    %12 = tpu.dynamic_rotate %0 by %c7_i32 dim 1 : vector<8x128xf32>, i32 -> vector<8x128xf32>
    %13 = vector.extract_strided_slice %1 {offsets = [2, 0], sizes = [1, 128], strides = [1, 1]} : vector<9x128xf32> to vector<1x128xf32>
    %14 = vector.broadcast %13 : vector<1x128xf32> to vector<8x128xf32>
    %15 = arith.mulf %12, %14 : vector<8x128xf32>
    %c16 = arith.constant 16 : index
    %c0_6 = arith.constant 0 : index
    %16 = vector.load %arg6[%c16, %c0_6] : memref<72x128xf32, #tpu.memory_space<vmem>>, vector<8x128xf32>
    tpu.vector_store %arg6[%c16, %c0_6], %15 {strides = array<i32>} : memref<72x128xf32, #tpu.memory_space<vmem>>, vector<8x128xf32>,
    %c1_i32 = arith.constant 1 : i32
    %17 = tpu.dynamic_rotate %0 by %c1_i32 dim 1 : vector<8x128xf32>, i32 -> vector<8x128xf32>
    %18 = vector.extract_strided_slice %1 {offsets = [3, 0], sizes = [1, 128], strides = [1, 1]} : vector<9x128xf32> to vector<1x128xf32>
    %19 = vector.broadcast %18 : vector<1x128xf32> to vector<8x128xf32>
    %20 = arith.mulf %17, %19 : vector<8x128xf32>
    %c24 = arith.constant 24 : index
    %c0_7 = arith.constant 0 : index
    %21 = vector.load %arg6[%c24, %c0_7] : memref<72x128xf32, #tpu.memory_space<vmem>>, vector<8x128xf32>
    tpu.vector_store %arg6[%c24, %c0_7], %20 {strides = array<i32>} : memref<72x128xf32, #tpu.memory_space<vmem>>, vector<8x128xf32>,
    %22 = vector.extract_strided_slice %1 {offsets = [4, 0], sizes = [1, 128], strides = [1, 1]} : vector<9x128xf32> to vector<1x128xf32>
    %23 = vector.broadcast %22 : vector<1x128xf32> to vector<8x128xf32>
    %24 = arith.mulf %0, %23 : vector<8x128xf32>
    %c32 = arith.constant 32 : index
    %c0_8 = arith.constant 0 : index
    %25 = vector.load %arg6[%c32, %c0_8] : memref<72x128xf32, #tpu.memory_space<vmem>>, vector<8x128xf32>
    tpu.vector_store %arg6[%c32, %c0_8], %24 {strides = array<i32>} : memref<72x128xf32, #tpu.memory_space<vmem>>, vector<8x128xf32>,
    %c127_i32 = arith.constant 127 : i32
    %26 = tpu.dynamic_rotate %0 by %c127_i32 dim 1 : vector<8x128xf32>, i32 -> vector<8x128xf32>
    %27 = vector.extract_strided_slice %1 {offsets = [5, 0], sizes = [1, 128], strides = [1, 1]} : vector<9x128xf32> to vector<1x128xf32>
    %28 = vector.broadcast %27 : vector<1x128xf32> to vector<8x128xf32>
    %29 = arith.mulf %26, %28 : vector<8x128xf32>
    %c40 = arith.constant 40 : index
    %c0_9 = arith.constant 0 : index
    %30 = vector.load %arg6[%c40, %c0_9] : memref<72x128xf32, #tpu.memory_space<vmem>>, vector<8x128xf32>
    tpu.vector_store %arg6[%c40, %c0_9], %29 {strides = array<i32>} : memref<72x128xf32, #tpu.memory_space<vmem>>, vector<8x128xf32>,
    %c121_i32 = arith.constant 121 : i32
    %31 = tpu.dynamic_rotate %0 by %c121_i32 dim 1 : vector<8x128xf32>, i32 -> vector<8x128xf32>
    %32 = vector.extract_strided_slice %1 {offsets = [6, 0], sizes = [1, 128], strides = [1, 1]} : vector<9x128xf32> to vector<1x128xf32>
    %33 = vector.broadcast %32 : vector<1x128xf32> to vector<8x128xf32>
    %34 = arith.mulf %31, %33 : vector<8x128xf32>
    %c48 = arith.constant 48 : index
    %c0_10 = arith.constant 0 : index
    %35 = vector.load %arg6[%c48, %c0_10] : memref<72x128xf32, #tpu.memory_space<vmem>>, vector<8x128xf32>
    tpu.vector_store %arg6[%c48, %c0_10], %34 {strides = array<i32>} : memref<72x128xf32, #tpu.memory_space<vmem>>, vector<8x128xf32>,
    %c120_i32 = arith.constant 120 : i32
    %36 = tpu.dynamic_rotate %0 by %c120_i32 dim 1 : vector<8x128xf32>, i32 -> vector<8x128xf32>
    %37 = vector.extract_strided_slice %1 {offsets = [7, 0], sizes = [1, 128], strides = [1, 1]} : vector<9x128xf32> to vector<1x128xf32>
    %38 = vector.broadcast %37 : vector<1x128xf32> to vector<8x128xf32>
    %39 = arith.mulf %36, %38 : vector<8x128xf32>
    %c56 = arith.constant 56 : index
    %c0_11 = arith.constant 0 : index
    %40 = vector.load %arg6[%c56, %c0_11] : memref<72x128xf32, #tpu.memory_space<vmem>>, vector<8x128xf32>
    tpu.vector_store %arg6[%c56, %c0_11], %39 {strides = array<i32>} : memref<72x128xf32, #tpu.memory_space<vmem>>, vector<8x128xf32>,
    %c119_i32 = arith.constant 119 : i32
    %41 = tpu.dynamic_rotate %0 by %c119_i32 dim 1 : vector<8x128xf32>, i32 -> vector<8x128xf32>
    %42 = vector.extract_strided_slice %1 {offsets = [8, 0], sizes = [1, 128], strides = [1, 1]} : vector<9x128xf32> to vector<1x128xf32>
    %43 = vector.broadcast %42 : vector<1x128xf32> to vector<8x128xf32>
    %44 = arith.mulf %41, %43 : vector<8x128xf32>
    %c64 = arith.constant 64 : index
    %c0_12 = arith.constant 0 : index
    %45 = vector.load %arg6[%c64, %c0_12] : memref<72x128xf32, #tpu.memory_space<vmem>>, vector<8x128xf32>
    tpu.vector_store %arg6[%c64, %c0_12], %44 {strides = array<i32>} : memref<72x128xf32, #tpu.memory_space<vmem>>, vector<8x128xf32>,
    %c0_13 = arith.constant 0 : index
    %c0_14 = arith.constant 0 : index
    %46 = vector.load %arg1[%c0_13, %c0_14] : memref<8x72xf32, #tpu.memory_space<vmem>>, vector<8x72xf32>
    %c0_15 = arith.constant 0 : index
    %c0_16 = arith.constant 0 : index
    %47 = vector.load %arg6[%c0_15, %c0_16] : memref<72x128xf32, #tpu.memory_space<vmem>>, vector<72x128xf32>
    %cst = arith.constant dense<0.000000e+00> : vector<8x128xf32>
    %48 = tpu.matmul %46, %47, %cst {dimension_numbers = #tpu.dot_dimension_numbers<[1], [0], [0], [1], [0, 0, 1, 1], [], []>} : vector<8x72xf32>, vector<72x128xf32>, vector<8x128xf32> -> vector<8x128xf32>
    %cst_17 = arith.constant dense<0.000000e+00> : vector<8xf32>
    %49 = vector.multi_reduction <add>, %48, %cst_17 [1] : vector<8x128xf32> to vector<8xf32>
    %50 = vector.shape_cast %49 : vector<8xf32> to vector<8x1xf32>
    %cst_18 = arith.constant 7.812500e-03 : f32
    %51 = vector.broadcast %cst_18 : f32 to vector<8x1xf32>
    %52 = arith.mulf %50, %51 : vector<8x1xf32>
    %53 = vector.broadcast %52 : vector<8x1xf32> to vector<8x128xf32>
    %54 = arith.subf %48, %53 : vector<8x128xf32>
    %55 = arith.mulf %54, %54 : vector<8x128xf32>
    %cst_19 = arith.constant dense<0.000000e+00> : vector<8xf32>
    %56 = vector.multi_reduction <add>, %55, %cst_19 [1] : vector<8x128xf32> to vector<8xf32>
    %57 = vector.shape_cast %56 : vector<8xf32> to vector<8x1xf32>
    %cst_20 = arith.constant 7.812500e-03 : f32
    %58 = vector.broadcast %cst_20 : f32 to vector<8x1xf32>
    %59 = arith.mulf %57, %58 : vector<8x1xf32>
    %cst_21 = arith.constant 9.99999974E-6 : f32
    %60 = vector.broadcast %cst_21 : f32 to vector<8x1xf32>
    %61 = arith.addf %59, %60 : vector<8x1xf32>
    %62 = math.rsqrt %61 : vector<8x1xf32>
    %c0_22 = arith.constant 0 : index
    %c0_23 = arith.constant 0 : index
    %63 = vector.load %arg3[%c0_22, %c0_23] : memref<8x1xf32, #tpu.memory_space<vmem>>, vector<8x1xf32>
    %64 = arith.mulf %62, %63 : vector<8x1xf32>
    %65 = vector.broadcast %64 : vector<8x1xf32> to vector<8x128xf32>
    %66 = arith.mulf %54, %65 : vector<8x128xf32>
    %c0_24 = arith.constant 0 : index
    %c0_25 = arith.constant 0 : index
    %67 = vector.load %arg4[%c0_24, %c0_25] : memref<8x1xf32, #tpu.memory_space<vmem>>, vector<8x1xf32>
    %68 = vector.broadcast %67 : vector<8x1xf32> to vector<8x128xf32>
    %69 = arith.addf %66, %68 : vector<8x128xf32>
    %cst_26 = arith.constant 0.000000e+00 : f32
    %70 = vector.broadcast %cst_26 : f32 to vector<8x128xf32>
    %71 = arith.maximumf %69, %70 : vector<8x128xf32>
    %c0_27 = arith.constant 0 : index
    %c0_28 = arith.constant 0 : index
    %72 = vector.load %arg5[%c0_27, %c0_28] : memref<8x128xf32, #tpu.memory_space<vmem>>, vector<8x128xf32>
    tpu.vector_store %arg5[%c0_27, %c0_28], %71 {strides = array<i32>} : memref<8x128xf32, #tpu.memory_space<vmem>>, vector<8x128xf32>,
    return
  }
}

module attributes {stable_mosaic.version = 11 : i64} {
  func.func @_conv_stage_kernel(%arg0: memref<8x128xf32, #tpu.memory_space<vmem>>, %arg1: memref<8x72xf32, #tpu.memory_space<vmem>>, %arg2: memref<9x128xf32, #tpu.memory_space<vmem>>, %arg3: memref<8x1xf32, #tpu.memory_space<vmem>>, %arg4: memref<8x1xf32, #tpu.memory_space<vmem>>, %arg5: memref<8x128xf32, #tpu.memory_space<vmem>>, %arg6: memref<128x32xf32, #tpu.memory_space<vmem>>, %arg7: memref<8x32xf32, #tpu.memory_space<vmem>>, %arg8: memref<72x128xf32, #tpu.memory_space<vmem>>) attributes {dimension_semantics = [], scalar_prefetch = 0 : i64, scratch_operands = 1 : i64, tpu.core_type = #tpu.core_type<tc>} {
    %c0 = arith.constant 0 : index
    %c0_0 = arith.constant 0 : index
    %0 = vector.load %arg0[%c0, %c0_0] : memref<8x128xf32, #tpu.memory_space<vmem>>, vector<8x128xf32>
    %c0_1 = arith.constant 0 : index
    %c0_2 = arith.constant 0 : index
    %1 = vector.load %arg2[%c0_1, %c0_2] : memref<9x128xf32, #tpu.memory_space<vmem>>, vector<9x128xf32>
    %c9_i32 = arith.constant 9 : i32
    %2 = tpu.dynamic_rotate %0 by %c9_i32 dim 1 : vector<8x128xf32>, i32 -> vector<8x128xf32>
    %3 = vector.extract_strided_slice %1 {offsets = [0, 0], sizes = [1, 128], strides = [1, 1]} : vector<9x128xf32> to vector<1x128xf32>
    %4 = vector.broadcast %3 : vector<1x128xf32> to vector<8x128xf32>
    %5 = arith.mulf %2, %4 : vector<8x128xf32>
    %c0_3 = arith.constant 0 : index
    %c0_4 = arith.constant 0 : index
    %6 = vector.load %arg8[%c0_3, %c0_4] : memref<72x128xf32, #tpu.memory_space<vmem>>, vector<8x128xf32>
    tpu.vector_store %arg8[%c0_3, %c0_4], %5 {strides = array<i32>} : memref<72x128xf32, #tpu.memory_space<vmem>>, vector<8x128xf32>,
    %c8_i32 = arith.constant 8 : i32
    %7 = tpu.dynamic_rotate %0 by %c8_i32 dim 1 : vector<8x128xf32>, i32 -> vector<8x128xf32>
    %8 = vector.extract_strided_slice %1 {offsets = [1, 0], sizes = [1, 128], strides = [1, 1]} : vector<9x128xf32> to vector<1x128xf32>
    %9 = vector.broadcast %8 : vector<1x128xf32> to vector<8x128xf32>
    %10 = arith.mulf %7, %9 : vector<8x128xf32>
    %c8 = arith.constant 8 : index
    %c0_5 = arith.constant 0 : index
    %11 = vector.load %arg8[%c8, %c0_5] : memref<72x128xf32, #tpu.memory_space<vmem>>, vector<8x128xf32>
    tpu.vector_store %arg8[%c8, %c0_5], %10 {strides = array<i32>} : memref<72x128xf32, #tpu.memory_space<vmem>>, vector<8x128xf32>,
    %c7_i32 = arith.constant 7 : i32
    %12 = tpu.dynamic_rotate %0 by %c7_i32 dim 1 : vector<8x128xf32>, i32 -> vector<8x128xf32>
    %13 = vector.extract_strided_slice %1 {offsets = [2, 0], sizes = [1, 128], strides = [1, 1]} : vector<9x128xf32> to vector<1x128xf32>
    %14 = vector.broadcast %13 : vector<1x128xf32> to vector<8x128xf32>
    %15 = arith.mulf %12, %14 : vector<8x128xf32>
    %c16 = arith.constant 16 : index
    %c0_6 = arith.constant 0 : index
    %16 = vector.load %arg8[%c16, %c0_6] : memref<72x128xf32, #tpu.memory_space<vmem>>, vector<8x128xf32>
    tpu.vector_store %arg8[%c16, %c0_6], %15 {strides = array<i32>} : memref<72x128xf32, #tpu.memory_space<vmem>>, vector<8x128xf32>,
    %c1_i32 = arith.constant 1 : i32
    %17 = tpu.dynamic_rotate %0 by %c1_i32 dim 1 : vector<8x128xf32>, i32 -> vector<8x128xf32>
    %18 = vector.extract_strided_slice %1 {offsets = [3, 0], sizes = [1, 128], strides = [1, 1]} : vector<9x128xf32> to vector<1x128xf32>
    %19 = vector.broadcast %18 : vector<1x128xf32> to vector<8x128xf32>
    %20 = arith.mulf %17, %19 : vector<8x128xf32>
    %c24 = arith.constant 24 : index
    %c0_7 = arith.constant 0 : index
    %21 = vector.load %arg8[%c24, %c0_7] : memref<72x128xf32, #tpu.memory_space<vmem>>, vector<8x128xf32>
    tpu.vector_store %arg8[%c24, %c0_7], %20 {strides = array<i32>} : memref<72x128xf32, #tpu.memory_space<vmem>>, vector<8x128xf32>,
    %22 = vector.extract_strided_slice %1 {offsets = [4, 0], sizes = [1, 128], strides = [1, 1]} : vector<9x128xf32> to vector<1x128xf32>
    %23 = vector.broadcast %22 : vector<1x128xf32> to vector<8x128xf32>
    %24 = arith.mulf %0, %23 : vector<8x128xf32>
    %c32 = arith.constant 32 : index
    %c0_8 = arith.constant 0 : index
    %25 = vector.load %arg8[%c32, %c0_8] : memref<72x128xf32, #tpu.memory_space<vmem>>, vector<8x128xf32>
    tpu.vector_store %arg8[%c32, %c0_8], %24 {strides = array<i32>} : memref<72x128xf32, #tpu.memory_space<vmem>>, vector<8x128xf32>,
    %c127_i32 = arith.constant 127 : i32
    %26 = tpu.dynamic_rotate %0 by %c127_i32 dim 1 : vector<8x128xf32>, i32 -> vector<8x128xf32>
    %27 = vector.extract_strided_slice %1 {offsets = [5, 0], sizes = [1, 128], strides = [1, 1]} : vector<9x128xf32> to vector<1x128xf32>
    %28 = vector.broadcast %27 : vector<1x128xf32> to vector<8x128xf32>
    %29 = arith.mulf %26, %28 : vector<8x128xf32>
    %c40 = arith.constant 40 : index
    %c0_9 = arith.constant 0 : index
    %30 = vector.load %arg8[%c40, %c0_9] : memref<72x128xf32, #tpu.memory_space<vmem>>, vector<8x128xf32>
    tpu.vector_store %arg8[%c40, %c0_9], %29 {strides = array<i32>} : memref<72x128xf32, #tpu.memory_space<vmem>>, vector<8x128xf32>,
    %c121_i32 = arith.constant 121 : i32
    %31 = tpu.dynamic_rotate %0 by %c121_i32 dim 1 : vector<8x128xf32>, i32 -> vector<8x128xf32>
    %32 = vector.extract_strided_slice %1 {offsets = [6, 0], sizes = [1, 128], strides = [1, 1]} : vector<9x128xf32> to vector<1x128xf32>
    %33 = vector.broadcast %32 : vector<1x128xf32> to vector<8x128xf32>
    %34 = arith.mulf %31, %33 : vector<8x128xf32>
    %c48 = arith.constant 48 : index
    %c0_10 = arith.constant 0 : index
    %35 = vector.load %arg8[%c48, %c0_10] : memref<72x128xf32, #tpu.memory_space<vmem>>, vector<8x128xf32>
    tpu.vector_store %arg8[%c48, %c0_10], %34 {strides = array<i32>} : memref<72x128xf32, #tpu.memory_space<vmem>>, vector<8x128xf32>,
    %c120_i32 = arith.constant 120 : i32
    %36 = tpu.dynamic_rotate %0 by %c120_i32 dim 1 : vector<8x128xf32>, i32 -> vector<8x128xf32>
    %37 = vector.extract_strided_slice %1 {offsets = [7, 0], sizes = [1, 128], strides = [1, 1]} : vector<9x128xf32> to vector<1x128xf32>
    %38 = vector.broadcast %37 : vector<1x128xf32> to vector<8x128xf32>
    %39 = arith.mulf %36, %38 : vector<8x128xf32>
    %c56 = arith.constant 56 : index
    %c0_11 = arith.constant 0 : index
    %40 = vector.load %arg8[%c56, %c0_11] : memref<72x128xf32, #tpu.memory_space<vmem>>, vector<8x128xf32>
    tpu.vector_store %arg8[%c56, %c0_11], %39 {strides = array<i32>} : memref<72x128xf32, #tpu.memory_space<vmem>>, vector<8x128xf32>,
    %c119_i32 = arith.constant 119 : i32
    %41 = tpu.dynamic_rotate %0 by %c119_i32 dim 1 : vector<8x128xf32>, i32 -> vector<8x128xf32>
    %42 = vector.extract_strided_slice %1 {offsets = [8, 0], sizes = [1, 128], strides = [1, 1]} : vector<9x128xf32> to vector<1x128xf32>
    %43 = vector.broadcast %42 : vector<1x128xf32> to vector<8x128xf32>
    %44 = arith.mulf %41, %43 : vector<8x128xf32>
    %c64 = arith.constant 64 : index
    %c0_12 = arith.constant 0 : index
    %45 = vector.load %arg8[%c64, %c0_12] : memref<72x128xf32, #tpu.memory_space<vmem>>, vector<8x128xf32>
    tpu.vector_store %arg8[%c64, %c0_12], %44 {strides = array<i32>} : memref<72x128xf32, #tpu.memory_space<vmem>>, vector<8x128xf32>,
    %c0_13 = arith.constant 0 : index
    %c0_14 = arith.constant 0 : index
    %46 = vector.load %arg1[%c0_13, %c0_14] : memref<8x72xf32, #tpu.memory_space<vmem>>, vector<8x72xf32>
    %c0_15 = arith.constant 0 : index
    %c0_16 = arith.constant 0 : index
    %47 = vector.load %arg8[%c0_15, %c0_16] : memref<72x128xf32, #tpu.memory_space<vmem>>, vector<72x128xf32>
    %cst = arith.constant dense<0.000000e+00> : vector<8x128xf32>
    %48 = tpu.matmul %46, %47, %cst {dimension_numbers = #tpu.dot_dimension_numbers<[1], [0], [0], [1], [0, 0, 1, 1], [], []>} : vector<8x72xf32>, vector<72x128xf32>, vector<8x128xf32> -> vector<8x128xf32>
    %cst_17 = arith.constant dense<0.000000e+00> : vector<8xf32>
    %49 = vector.multi_reduction <add>, %48, %cst_17 [1] : vector<8x128xf32> to vector<8xf32>
    %50 = vector.shape_cast %49 : vector<8xf32> to vector<8x1xf32>
    %cst_18 = arith.constant 7.812500e-03 : f32
    %51 = vector.broadcast %cst_18 : f32 to vector<8x1xf32>
    %52 = arith.mulf %50, %51 : vector<8x1xf32>
    %53 = vector.broadcast %52 : vector<8x1xf32> to vector<8x128xf32>
    %54 = arith.subf %48, %53 : vector<8x128xf32>
    %55 = arith.mulf %54, %54 : vector<8x128xf32>
    %cst_19 = arith.constant dense<0.000000e+00> : vector<8xf32>
    %56 = vector.multi_reduction <add>, %55, %cst_19 [1] : vector<8x128xf32> to vector<8xf32>
    %57 = vector.shape_cast %56 : vector<8xf32> to vector<8x1xf32>
    %cst_20 = arith.constant 7.812500e-03 : f32
    %58 = vector.broadcast %cst_20 : f32 to vector<8x1xf32>
    %59 = arith.mulf %57, %58 : vector<8x1xf32>
    %cst_21 = arith.constant 9.99999974E-6 : f32
    %60 = vector.broadcast %cst_21 : f32 to vector<8x1xf32>
    %61 = arith.addf %59, %60 : vector<8x1xf32>
    %62 = math.rsqrt %61 : vector<8x1xf32>
    %c0_22 = arith.constant 0 : index
    %c0_23 = arith.constant 0 : index
    %63 = vector.load %arg3[%c0_22, %c0_23] : memref<8x1xf32, #tpu.memory_space<vmem>>, vector<8x1xf32>
    %64 = arith.mulf %62, %63 : vector<8x1xf32>
    %65 = vector.broadcast %64 : vector<8x1xf32> to vector<8x128xf32>
    %66 = arith.mulf %54, %65 : vector<8x128xf32>
    %c0_24 = arith.constant 0 : index
    %c0_25 = arith.constant 0 : index
    %67 = vector.load %arg4[%c0_24, %c0_25] : memref<8x1xf32, #tpu.memory_space<vmem>>, vector<8x1xf32>
    %68 = vector.broadcast %67 : vector<8x1xf32> to vector<8x128xf32>
    %69 = arith.addf %66, %68 : vector<8x128xf32>
    %c0_26 = arith.constant 0 : index
    %c0_27 = arith.constant 0 : index
    %70 = vector.load %arg5[%c0_26, %c0_27] : memref<8x128xf32, #tpu.memory_space<vmem>>, vector<8x128xf32>
    %71 = arith.addf %69, %70 : vector<8x128xf32>
    %cst_28 = arith.constant 0.000000e+00 : f32
    %72 = vector.broadcast %cst_28 : f32 to vector<8x128xf32>
    %73 = arith.maximumf %71, %72 : vector<8x128xf32>
    %c0_29 = arith.constant 0 : index
    %c0_30 = arith.constant 0 : index
    %74 = vector.load %arg6[%c0_29, %c0_30] : memref<128x32xf32, #tpu.memory_space<vmem>>, vector<128x32xf32>
    %cst_31 = arith.constant dense<0.000000e+00> : vector<8x32xf32>
    %75 = tpu.matmul %73, %74, %cst_31 {dimension_numbers = #tpu.dot_dimension_numbers<[1], [0], [0], [1], [0, 0, 1, 1], [], []>} : vector<8x128xf32>, vector<128x32xf32>, vector<8x32xf32> -> vector<8x32xf32>
    %c0_32 = arith.constant 0 : index
    %c0_33 = arith.constant 0 : index
    %76 = vector.load %arg7[%c0_32, %c0_33] : memref<8x32xf32, #tpu.memory_space<vmem>>, vector<8x32xf32>
    tpu.vector_store %arg7[%c0_32, %c0_33], %75 {strides = array<i32>} : memref<8x32xf32, #tpu.memory_space<vmem>>, vector<8x32xf32>,
    return
  }
}

module attributes {stable_mosaic.version = 11 : i64} {
  func.func @_linear_kernel(%arg0: memref<2x128xf32, #tpu.memory_space<vmem>>, %arg1: memref<128x10xf32, #tpu.memory_space<vmem>>, %arg2: memref<1x10xf32, #tpu.memory_space<vmem>>, %arg3: memref<2x10xf32, #tpu.memory_space<vmem>>) attributes {dimension_semantics = [], scalar_prefetch = 0 : i64, scratch_operands = 0 : i64, tpu.core_type = #tpu.core_type<tc>} {
    %c0 = arith.constant 0 : index
    %c0_0 = arith.constant 0 : index
    %0 = vector.load %arg0[%c0, %c0_0] : memref<2x128xf32, #tpu.memory_space<vmem>>, vector<2x128xf32>
    %c0_1 = arith.constant 0 : index
    %c0_2 = arith.constant 0 : index
    %1 = vector.load %arg1[%c0_1, %c0_2] : memref<128x10xf32, #tpu.memory_space<vmem>>, vector<128x10xf32>
    %cst = arith.constant dense<0.000000e+00> : vector<2x10xf32>
    %2 = tpu.matmul %0, %1, %cst {dimension_numbers = #tpu.dot_dimension_numbers<[1], [0], [0], [1], [0, 0, 1, 1], [], []>} : vector<2x128xf32>, vector<128x10xf32>, vector<2x10xf32> -> vector<2x10xf32>
    %c0_3 = arith.constant 0 : index
    %c0_4 = arith.constant 0 : index
    %3 = vector.load %arg2[%c0_3, %c0_4] : memref<1x10xf32, #tpu.memory_space<vmem>>, vector<1x10xf32>
    %4 = vector.broadcast %3 : vector<1x10xf32> to vector<2x10xf32>
    %5 = arith.addf %2, %4 : vector<2x10xf32>
    %6 = arith.negf %5 : vector<2x10xf32>
    %7 = math.exp %6 : vector<2x10xf32>
    %cst_5 = arith.constant 1.000000e+00 : f32
    %8 = vector.broadcast %cst_5 : f32 to vector<2x10xf32>
    %9 = arith.addf %8, %7 : vector<2x10xf32>
    %10 = arith.divf %8, %9 : vector<2x10xf32>
    %c0_6 = arith.constant 0 : index
    %c0_7 = arith.constant 0 : index
    %11 = vector.load %arg3[%c0_6, %c0_7] : memref<2x10xf32, #tpu.memory_space<vmem>>, vector<2x10xf32>
    tpu.vector_store %arg3[%c0_6, %c0_7], %10 {strides = array<i32>} : memref<2x10xf32, #tpu.memory_space<vmem>>, vector<2x10xf32>,
    return
  }
}

</mosaic_0001>

<bundles_post_ra>
// kernel: _lambda_.5
= control target key start
LH: loop header
LB: loop body
LE: loop exit
PB: predicated region body
PF: predicated region fallthrough
CT: control target
= control target key end

     0   :  { %v269_v1 = vmov 0.0|0.0   ;;  %s270_s20 = smov 7   ;;  %s271_s21 = smov 9   ;;  %vm276_vm0 = vmmov 0   ;;  %v277_v2 = vmov 0.0   ;;  %v25_v3 = vlaneseq  ;;  %s336_s0 = inlined_call_operand.vmem [shape: f32[8,128], index: 0, kind: input, shape index: {}]   ;;  %s337_s2 = inlined_call_operand.vmem [shape: f32[9,128], index: 2, kind: input, shape index: {}]   ;;  %s338_s1 = inlined_call_operand.vmem [shape: f32[8,72], index: 1, kind: input, shape index: {}]   ;;  %s339_s4 = inlined_call_operand.vmem [shape: f32[8,1], index: 4, kind: input, shape index: {}]   ;;  %s340_s3 = inlined_call_operand.vmem [shape: f32[8,1], index: 3, kind: input, shape index: {}]   ;;  %s341_s5 = inlined_call_operand.vmem [shape: f32[8,128], index: 5, kind: output, shape index: {}]  }
   0x1   :  { %v20_v0 = vld [vmem:[%s336_s0] sm:$0xff]  ;;  %241 = vmatprep.subr.bf16.mxu0 %v269_v1  ;;  %s272_s22 = smov 1   ;;  %s273_s23 = smov 8   ;;  %238 = vmatprep.mubr.msk.f32.mxu0 %vm276_vm0, %v277_v2  ;;  %v208_v41 = vld [vmem:[%s337_s2 + $0x8] ss:$0 sm:$0xff]  ;;  %vm103_vm1 = vcmask 588800  }
   0x2   :  { %39 = vrot.lane.b32.xlu1 %v20_v0, %s270_s20  ;;  %23 = vrot.lane.b32.xlu0 %v20_v0, %s271_s21  ;;  %s274_s24 = smov 127   ;;  %s275_s25 = smov 121   ;;  %v26_v4 = vshrl.u32 %v25_v3, 7  ;;  %v21_v7 = vld [vmem:[%s337_s2] sm:$0xff]  ;;  %v280_v51 = vmov 0  }
   0x3   :  { %s278_s26 = smov 120   ;;  %s279_s0 = smov 119   ;;  %v93_v44 = vld [vmem:[%s338_s1] sm:$0xff]  ;;  %265 = vset.pattern.permute.xlu0 %v280_v51  ;;  %266 = vset.pattern.permute.xlu1 %v280_v51 }
   0x4   :  { %v27_v5 = vsub.s32 0, %v26_v4  ;;  %v35_v6 = vsub.s32 1, %v26_v4  ;;  %v43_v8 = vsub.s32 2, %v26_v4  ;;  %v51_v9 = vsub.s32 3, %v26_v4  ;;  %v195_v52 = vld [vmem:[%s339_s4] sm:$0xff] }
   0x5   :  { %v57_v14 = vsub.s32 4, %v26_v4  ;;  %v65_v15 = vsub.s32 5, %v26_v4  ;;  %v73_v20 = vsub.s32 6, %v26_v4  ;;  %v81_v21 = vsub.s32 7, %v26_v4  ;;  %v187_v56 = vld [vmem:[%s340_s3] sm:$0xff] }
   0x6   :  { %47 = vrot.lane.b32.xlu1 %v20_v0, %s272_s22  ;;  %31 = vrot.lane.b32.xlu0 %v20_v0, %s273_s23  ;;  %v28_v12 = vrot.slane %v21_v7, %v27_v5  ;;  %v36_v13 = vrot.slane %v21_v7, %v35_v6  ;;  %v44_v16 = vrot.slane %v21_v7, %v43_v8 }
   0x7   :  { %v52_v17 = vrot.slane %v21_v7, %v51_v9  ;;  %v58_v24 = vrot.slane %v21_v7, %v57_v14  ;;  %v66_v25 = vrot.slane %v21_v7, %v65_v15  ;;  %v74_v32 = vrot.slane %v21_v7, %v73_v20 }
   0x8   :  { %v82_v33 = vrot.slane %v21_v7, %v81_v21 }
   0x9   :  { %v59_v30 = vmul.f32 %v58_v24, %v20_v0 }
   0xa   :  { %61 = vrot.lane.b32.xlu0 %v20_v0, %s274_s24  ;;  %69 = vrot.lane.b32.xlu1 %v20_v0, %s275_s25 }
   0xe   :  { %77 = vrot.lane.b32.xlu0 %v20_v0, %s278_s26  ;;  %85 = vrot.lane.b32.xlu1 %v20_v0, %s279_s0 }
  0x74   :  { %v40_v10 = vpop.permute.xlu1 %39  ;;  %v24_v11 = vpop.permute.xlu0 %23 }
  0x75   :  { %v29_v22 = vmul.f32 %v28_v12, %v24_v11  ;;  %v45_v26 = vmul.f32 %v44_v16, %v40_v10 }
  0x78   :  { %v48_v18 = vpop.permute.xlu1 %47  ;;  %v32_v19 = vpop.permute.xlu0 %31 }
  0x79   :  { %v37_v23 = vmul.f32 %v36_v13, %v32_v19  ;;  %v53_v27 = vmul.f32 %v52_v17, %v48_v18 }
  0x7b   :  { %v242_v28 = vpack.c.bf16 %v37_v23, %v29_v22  ;;  %v245_v35 = vpack.c.bf16 %v53_v27, %v45_v26 }
  0x7c   :  { %v62_v29 = vpop.permute.xlu0 %61  ;;  %v70_v34 = vpop.permute.xlu1 %69 }
  0x7d   :  { %243 = vmatpush3.bf16.msra.mxu0 %v242_v28  ;;  %v67_v31 = vmul.f32 %v66_v25, %v62_v29  ;;  %v75_v38 = vmul.f32 %v74_v32, %v70_v34 }
  0x7e   :  { %244 = vmatprep.subr.bf16.mxu0 %v269_v1 }
  0x7f   :  { %v248_v37 = vpack.c.bf16 %v67_v31, %v59_v30 }
  0x80   :  { %v78_v36 = vpop.permute.xlu0 %77  ;;  %v86_v42 = vpop.permute.xlu1 %85 }
  0x81   :  { %246 = vmatpush3.bf16.msra.mxu0 %v245_v35  ;;  %v83_v39 = vmul.f32 %v82_v33, %v78_v36  ;;  %v91_v43 = vmul.f32 %v208_v41, %v86_v42 }
  0x82   :  { %247 = vmatprep.subr.bf16.mxu0 %v269_v1 }
  0x83   :  { %v251_v40 = vpack.c.bf16 %v83_v39, %v75_v38 }
  0x85   :  { %249 = vmatpush3.bf16.msra.mxu0 %v248_v37 }
  0x86   :  { %250 = vmatprep.subr.bf16.mxu0 %v269_v1 }
  0x89   :  { %252 = vmatpush3.bf16.msra.mxu0 %v251_v40 }
  0x8a   :  { %236 = vmatprep.subr.mxu0 %v277_v2 }
  0x8d   :  { %237 = vmatpush3.msra.mxu0 %v91_v43 }
  0x8e   :  { %239 = vmatmul.mubr.msk.f32.vlgmr.msra.gmra.mrb[0].mxu0 %vm103_vm1, %v93_v44 }
 0x161   :  { %v173_v45 = vpop.f32.mrb[0].mxu0 }
 0x162   :  { %177 = vadd.xlane.f32.xlu0 %v173_v45  ;;  %v240_v46 = vpop.f32.mrb[1].mxu0 }
 0x1ef   :  { %v178_v47 = vpop.xlane.xlu0 %177 }
 0x1f0   :  { %v179_v48 = vmul.f32 0.0078125, %v178_v47 }
 0x1f2   :  { %v180_v49 = vsub.f32 %v173_v45, %v179_v48 }
 0x1f4   :  { %v181_v50 = vmul.f32 %v180_v49, %v180_v49 }
 0x1f6   :  { %182 = vadd.xlane.f32.xlu1 %v181_v50 }
 0x207   :  { %198 = vperm.xlu1 %266, %v195_v52  }
 0x283   :  { %v183_v53 = vpop.xlane.xlu1 %182 }
 0x284   :  { %v184_v54 = vmul.f32 0.0078125, %v183_v53 }
 0x286   :  { %v185_v55 = vadd.f32 1e-05, %v184_v54 }
 0x287   :  { %v199_v60 = vpop.permute.xlu1 %198 }
 0x288   :  { %267 = vrsqrt.f32 %v185_v55 }
 0x292   :  { %v268_v57 = vpop.eup %267 }
 0x293   :  { %v188_v58 = vmul.f32 %v268_v57, %v187_v56 }
 0x295   :  { %191 = vperm.xlu0 %265, %v188_v58  }
 0x314   :  { %v192_v59 = vpop.permute.xlu0 %191 }
 0x315   :  { %v194_v61 = vmul.f32 %v192_v59, %v180_v49 }
 0x317   :  { %v201_v62 = vadd.f32 %v199_v60, %v194_v61 }
 0x319   :  { %v202_v63 = vmax.f32 %v201_v62, 0.0 }
 0x31b   :  { %203 = vst [vmem:[%s341_s5] sm:$0xff] %v202_v63 }

// kernel: _lambda_.7
= control target key start
LH: loop header
LB: loop body
LE: loop exit
PB: predicated region body
PF: predicated region fallthrough
CT: control target
= control target key end

     0   :  { %v241_v3 = vmov 0.0|0.0   ;;  %vm242_vm0 = vmmov 0   ;;  %v243_v6 = vmov 0.0   ;;  %s331_s0 = inlined_call_operand.vmem [shape: f32[2,128], index: 0, kind: input, shape index: {}]   ;;  %s332_s1 = inlined_call_operand.vmem [shape: f32[128,10], index: 1, kind: input, shape index: {}]   ;;  %s333_s2 = inlined_call_operand.vmem [shape: f32[1,10], index: 2, kind: input, shape index: {}]   ;;  %s334_s3 = inlined_call_operand.hbm [shape: f32[2,10], index: 3, kind: output, shape index: {}]  }
   0x1   :  { %v16_v0 = vld [vmem:[%s332_s1] sm:$0xff]  ;;  %v17_v1 = vld [vmem:[%s332_s1 + $0x8] sm:$0xff]  ;;  %v18_v2 = vld [vmem:[%s332_s1 + $0x10] sm:$0xff]  ;;  %185 = vmatprep.subr.bf16.mxu0 %v241_v3  ;;  %182 = vmatprep.mubr.msk.f32.mxu0 %vm242_vm0, %v243_v6 }
   0x2   :  { %v186_v4 = vpack.c.bf16 %v17_v1, %v16_v0  ;;  %v19_v5 = vld [vmem:[%s332_s1 + $0x18] sm:$0xff]  ;;  %v20_v8 = vld [vmem:[%s332_s1 + $0x20] sm:$0xff]  ;;  %v21_v9 = vld [vmem:[%s332_s1 + $0x28] sm:$0xff] }
   0x3   :  { %v189_v7 = vpack.c.bf16 %v19_v5, %v18_v2 }
   0x4   :  { %187 = vmatpush3.bf16.msra.mxu0 %v186_v4 }
   0x5   :  { %188 = vmatprep.subr.bf16.mxu0 %v241_v3 }
   0x6   :  { %8 = vsyncpa [#allocation3], 0  ;;  %v192_v10 = vpack.c.bf16 %v21_v9, %v20_v8  ;;  %v22_v11 = vld [vmem:[%s332_s1 + $0x30] sm:$0xff]  ;;  %v23_v12 = vld [vmem:[%s332_s1 + $0x38] sm:$0xff]  ;;  %vm115_vm1 = vcmask 74752  }
   0x7   :  { %v195_v13 = vpack.c.bf16 %v23_v12, %v22_v11  ;;  %v24_v14 = vld [vmem:[%s332_s1 + $0x40] sm:$0xff]  ;;  %v25_v15 = vld [vmem:[%s332_s1 + $0x48] sm:$0xff]  ;;  %v26_v17 = vld [vmem:[%s332_s1 + $0x50] sm:$0xff] }
   0x8   :  { %190 = vmatpush3.bf16.msra.mxu0 %v189_v7  ;;  %v198_v16 = vpack.c.bf16 %v25_v15, %v24_v14  ;;  %v27_v18 = vld [vmem:[%s332_s1 + $0x58] sm:$0xff]  ;;  %v28_v20 = vld [vmem:[%s332_s1 + $0x60] sm:$0xff]  ;;  %v29_v21 = vld [vmem:[%s332_s1 + $0x68] sm:$0xff] }
   0x9   :  { %191 = vmatprep.subr.bf16.mxu0 %v241_v3  ;;  %v201_v19 = vpack.c.bf16 %v27_v18, %v26_v17  ;;  %v204_v22 = vpack.c.bf16 %v29_v21, %v28_v20  ;;  %v30_v23 = vld [vmem:[%s332_s1 + $0x70] sm:$0xff]  ;;  %v31_v24 = vld [vmem:[%s332_s1 + $0x78] sm:$0xff]  ;;  %v15_v26 = vld [vmem:[%s331_s0] sm:$0x3]  ;;  %s244_s1 = smov [#allocation2]  }
   0xa   :  { %v207_v25 = vpack.c.bf16 %v31_v24, %v30_v23  ;;  %v131_v27 = vld [vmem:[%s333_s2] ss:$0 sm:$0xff]  ;;  %s123_s21 = sshll.u32 %s244_s1, 4  ;;  %s124_s21 = int_to_ptr.vmem [resolvable:$true] %s123_s21 }
   0xb   :  { %s217_s0 = scalar_lea.vmem %s124_s21, 32  ;;  %p222_p1 = scmp.lt.s32.totalorder %s124_s21, %s124_s21 }
   0xc   :  { %193 = vmatpush3.bf16.msra.mxu0 %v192_v10  ;;  %p218_p0 = scmp.ne.s32.totalorder %s124_s21, %s217_s0  ;;  %p223_p2 = scmp.lt.s32.totalorder %s217_s0, %s217_s0 }
   0xd   :  { %194 = vmatprep.subr.bf16.mxu0 %v241_v3 }
   0xe   :  { %p224_p3 = por %p223_p2, %p222_p1 }
  0x10   :  { %196 = vmatpush3.bf16.msra.mxu0 %v195_v13  ;;  %p225_p4 = pnand %p224_p3, %p218_p0 }
  0x11   :  { %197 = vmatprep.subr.bf16.mxu0 %v241_v3 }
  0x14   :  { %199 = vmatpush3.bf16.msra.mxu0 %v198_v16 }
  0x15   :  { %200 = vmatprep.subr.bf16.mxu0 %v241_v3 }
  0x18   :  { %202 = vmatpush3.bf16.msra.mxu0 %v201_v19 }
  0x19   :  { %203 = vmatprep.subr.bf16.mxu0 %v241_v3 }
  0x1c   :  { %205 = vmatpush3.bf16.msra.mxu0 %v204_v22 }
  0x1d   :  { %206 = vmatprep.subr.bf16.mxu0 %v241_v3 }
  0x20   :  { %208 = vmatpush3.bf16.msra.mxu0 %v207_v25 }
  0x23   :  { %183 = vmatmul.mubr.f32.vlgmr.msra.gmra.mrb[0].mxu0 %v15_v26 }
  0xf6   :  { %v105_v28 = vpop.f32.mrb[0].mxu0 }
  0xf7   :  { %v106_v29 = vadd.f32 %v131_v27, %v105_v28  ;;  %v184_v30 = vpop.f32.mrb[1].mxu0 }
  0xf9   :  { %v132_v31 = vmul.f32 -1.442695, %v106_v29 }
  0xfb   :  { %213 = vpow2.f32 %v132_v31 }
 0x105   :  { %v214_v32 = vpop.eup %213 }
 0x106   :  { %v112_v33 = vadd.f32 1.0, %v214_v32 }
 0x108   :  { %215 = vrcp.f32 %v112_v33 }
 0x112   :  { %v216_v34 = vpop.eup %215 }
 0x113   :  { %116 = vst.msk [vmem:[#allocation2] sm:$0x3] %vm115_vm1, %v216_v34 }
 0x114   :  { %228 = shalt.err (!%p225_p4)
}
 0x115   :  { %s229_s23 = scalar_lea.hbm %s334_s3, 32 }
 0x116   :  { %p230_p5 = scmp.ne.s32.totalorder %s334_s3, %s229_s23  ;;  %p233_p6 = scmp.lt.u32.totalorder %s229_s23, %s334_s3 }
 0x118   :  { %p235_p7 = pnand %p233_p6, %p230_p5 }
 0x11a   :  { %238 = shalt.err (!%p235_p7)
}
 0x11b   :  { %126 = dma.vmem_to_hbm [thread:$0]  %s124_s21, 32, %s334_s3, [#allocation3]  }
 0x11c   :  { %239 = dma.done.wait [#allocation3], 32  }
 0x11d   :  { %240 = vsyncadd [#allocation3], 4294967264 }
 0x11e   :  { %130 = vsyncpa [#allocation3], 1 }

// kernel: _lambda_.6
= control target key start
LH: loop header
LB: loop body
LE: loop exit
PB: predicated region body
PF: predicated region fallthrough
CT: control target
= control target key end

     0   :  { %v440_v1 = vmov 0.0|0.0   ;;  %s441_s26 = smov 7   ;;  %s442_s27 = smov 9   ;;  %vm447_vm0 = vmmov 0   ;;  %v448_v2 = vmov 0.0   ;;  %v31_v3 = vlaneseq  ;;  %s576_s0 = inlined_call_operand.vmem [shape: f32[8,128], index: 0, kind: input, shape index: {}]   ;;  %s577_s2 = inlined_call_operand.vmem [shape: f32[9,128], index: 2, kind: input, shape index: {}]   ;;  %s578_s1 = inlined_call_operand.vmem [shape: f32[8,72], index: 1, kind: input, shape index: {}]   ;;  %s579_s4 = inlined_call_operand.vmem [shape: f32[8,1], index: 4, kind: input, shape index: {}]   ;;  %s580_s6 = inlined_call_operand.vmem [shape: f32[128,32], index: 6, kind: input, shape index: {}]   ;;  %s581_s3 = inlined_call_operand.vmem [shape: f32[8,1], index: 3, kind: input, shape index: {}]   ;;  %s582_s5 = inlined_call_operand.vmem [shape: f32[8,128], index: 5, kind: input, shape index: {}]   ;;  %s583_s7 = inlined_call_operand.vmem [shape: f32[8,32], index: 7, kind: output, shape index: {}]  }
   0x1   :  { %v26_v0 = vld [vmem:[%s576_s0] sm:$0xff]  ;;  %388 = vmatprep.subr.bf16.mxu0 %v440_v1  ;;  %400 = vmatprep.subr.bf16.mxu1 %v440_v1  ;;  %s443_s28 = smov 1   ;;  %s444_s29 = smov 8   ;;  %v303_v41 = vld [vmem:[%s577_s2 + $0x8] ss:$0 sm:$0xff]  ;;  %vm109_vm1 = vcmask 588800  }
   0x2   :  { %45 = vrot.lane.b32.xlu1 %v26_v0, %s441_s26  ;;  %29 = vrot.lane.b32.xlu0 %v26_v0, %s442_s27  ;;  %s445_s30 = smov 127   ;;  %s446_s8 = smov 121   ;;  %v32_v4 = vshrl.u32 %v31_v3, 7  ;;  %v27_v7 = vld [vmem:[%s577_s2] sm:$0xff]  ;;  %v451_v51 = vmov 0   ;;  %v212_v54 = vld [vmem:[%s580_s6 + $0x8] sm:$0xff] }
   0x3   :  { %350 = vmatprep.mubr.msk.f32.mxu0 %vm447_vm0, %v448_v2  ;;  %385 = vmatprep.mubr.msk.f32.mxu1 %vm447_vm0, %v448_v2  ;;  %s449_s0 = smov 120   ;;  %s450_s9 = smov 119   ;;  %v99_v44 = vld [vmem:[%s578_s1] sm:$0xff]  ;;  %v213_v56 = vld [vmem:[%s580_s6 + $0x10] sm:$0xff]  ;;  %v214_v57 = vld [vmem:[%s580_s6 + $0x18] sm:$0xff]  ;;  %vm297_vm2 = vcmask 261120  }
   0x4   :  { %v33_v5 = vsub.s32 0, %v32_v4  ;;  %v41_v6 = vsub.s32 1, %v32_v4  ;;  %v49_v8 = vsub.s32 2, %v32_v4  ;;  %v57_v9 = vsub.s32 3, %v32_v4  ;;  %436 = vset.pattern.permute.xlu0 %v451_v51  ;;  %437 = vset.pattern.permute.xlu1 %v451_v51  ;;  %v201_v52 = vld [vmem:[%s579_s4] sm:$0xff]  ;;  %v216_v60 = vld [vmem:[%s580_s6 + $0x28] sm:$0xff] }
   0x5   :  { %v63_v14 = vsub.s32 4, %v32_v4  ;;  %v71_v15 = vsub.s32 5, %v32_v4  ;;  %v79_v20 = vsub.s32 6, %v32_v4  ;;  %v87_v21 = vsub.s32 7, %v32_v4  ;;  %v211_v53 = vld [vmem:[%s580_s6] sm:$0xff]  ;;  %v217_v62 = vld [vmem:[%s580_s6 + $0x30] sm:$0xff] }
   0x6   :  { %53 = vrot.lane.b32.xlu1 %v26_v0, %s443_s28  ;;  %37 = vrot.lane.b32.xlu0 %v26_v0, %s444_s29  ;;  %v34_v12 = vrot.slane %v27_v7, %v33_v5  ;;  %v42_v13 = vrot.slane %v27_v7, %v41_v6  ;;  %v50_v16 = vrot.slane %v27_v7, %v49_v8  ;;  %v215_v59 = vld [vmem:[%s580_s6 + $0x20] sm:$0xff]  ;;  %v218_v63 = vld [vmem:[%s580_s6 + $0x38] sm:$0xff] }
   0x7   :  { %v58_v17 = vrot.slane %v27_v7, %v57_v9  ;;  %v64_v24 = vrot.slane %v27_v7, %v63_v14  ;;  %v72_v25 = vrot.slane %v27_v7, %v71_v15  ;;  %v80_v32 = vrot.slane %v27_v7, %v79_v20  ;;  %v220_v3 = vld [vmem:[%s580_s6 + $0x48] sm:$0xff]  ;;  %v221_v5 = vld [vmem:[%s580_s6 + $0x50] sm:$0xff]  ;;  %v222_v6 = vld [vmem:[%s580_s6 + $0x58] sm:$0xff] }
   0x8   :  { %v88_v33 = vrot.slane %v27_v7, %v87_v21  ;;  %v401_v55 = vpack.c.bf16 %v212_v54, %v211_v53  ;;  %v404_v58 = vpack.c.bf16 %v214_v57, %v213_v56  ;;  %v407_v61 = vpack.c.bf16 %v216_v60, %v215_v59  ;;  %v223_v14 = vld [vmem:[%s580_s6 + $0x60] sm:$0xff]  ;;  %v224_v15 = vld [vmem:[%s580_s6 + $0x68] sm:$0xff] }
   0x9   :  { %v65_v30 = vmul.f32 %v64_v24, %v26_v0  ;;  %v416_v7 = vpack.c.bf16 %v222_v6, %v221_v5 }
   0xa   :  { %67 = vrot.lane.b32.xlu0 %v26_v0, %s445_s30  ;;  %75 = vrot.lane.b32.xlu1 %v26_v0, %s446_s8 }
   0xb   :  { %402 = vmatpush3.bf16.msra.mxu1 %v401_v55 }
   0xc   :  { %403 = vmatprep.subr.bf16.mxu1 %v440_v1 }
   0xe   :  { %83 = vrot.lane.b32.xlu0 %v26_v0, %s449_s0  ;;  %91 = vrot.lane.b32.xlu1 %v26_v0, %s450_s9  ;;  %v410_v0 = vpack.c.bf16 %v218_v63, %v217_v62 }
   0xf   :  { %405 = vmatpush3.bf16.msra.mxu1 %v404_v58 }
  0x10   :  { %406 = vmatprep.subr.bf16.mxu1 %v440_v1 }
  0x13   :  { %408 = vmatpush3.bf16.msra.mxu1 %v407_v61 }
  0x14   :  { %409 = vmatprep.subr.bf16.mxu1 %v440_v1 }
  0x17   :  { %411 = vmatpush3.bf16.msra.mxu1 %v410_v0 }
  0x18   :  { %412 = vmatprep.subr.bf16.mxu1 %v440_v1 }
  0x74   :  { %v46_v10 = vpop.permute.xlu1 %45  ;;  %v30_v11 = vpop.permute.xlu0 %29 }
  0x75   :  { %v35_v22 = vmul.f32 %v34_v12, %v30_v11  ;;  %v51_v26 = vmul.f32 %v50_v16, %v46_v10  ;;  %v193_v11 = vld [vmem:[%s581_s3] sm:$0xff]  ;;  %v419_v16 = vpack.c.bf16 %v224_v15, %v223_v14 }
  0x78   :  { %v54_v18 = vpop.permute.xlu1 %53  ;;  %v38_v19 = vpop.permute.xlu0 %37 }
  0x79   :  { %v43_v23 = vmul.f32 %v42_v13, %v38_v19  ;;  %v59_v27 = vmul.f32 %v58_v17, %v54_v18  ;;  %v225_v17 = vld [vmem:[%s580_s6 + $0x70] sm:$0xff]  ;;  %v226_v18 = vld [vmem:[%s580_s6 + $0x78] sm:$0xff] }
  0x7a   :  { %v422_v19 = vpack.c.bf16 %v226_v18, %v225_v17 }
  0x7b   :  { %v389_v28 = vpack.c.bf16 %v43_v23, %v35_v22  ;;  %v392_v35 = vpack.c.bf16 %v59_v27, %v51_v26  ;;  %v208_v23 = vld [vmem:[%s582_s5] sm:$0xff] }
  0x7c   :  { %v68_v29 = vpop.permute.xlu0 %67  ;;  %v76_v34 = vpop.permute.xlu1 %75 }
  0x7d   :  { %390 = vmatpush3.bf16.msra.mxu0 %v389_v28  ;;  %v73_v31 = vmul.f32 %v72_v25, %v68_v29  ;;  %v81_v38 = vmul.f32 %v80_v32, %v76_v34 }
  0x7e   :  { %391 = vmatprep.subr.bf16.mxu0 %v440_v1 }
  0x7f   :  { %v395_v37 = vpack.c.bf16 %v73_v31, %v65_v30 }
  0x80   :  { %v84_v36 = vpop.permute.xlu0 %83  ;;  %v92_v42 = vpop.permute.xlu1 %91 }
  0x81   :  { %393 = vmatpush3.bf16.msra.mxu0 %v392_v35  ;;  %v89_v39 = vmul.f32 %v88_v33, %v84_v36  ;;  %v97_v43 = vmul.f32 %v303_v41, %v92_v42 }
  0x82   :  { %394 = vmatprep.subr.bf16.mxu0 %v440_v1 }
  0x83   :  { %v398_v40 = vpack.c.bf16 %v89_v39, %v81_v38 }
  0x85   :  { %396 = vmatpush3.bf16.msra.mxu0 %v395_v37 }
  0x86   :  { %397 = vmatprep.subr.bf16.mxu0 %v440_v1 }
  0x89   :  { %399 = vmatpush3.bf16.msra.mxu0 %v398_v40 }
  0x8a   :  { %348 = vmatprep.subr.mxu0 %v448_v2  ;;  %v219_v2 = vld [vmem:[%s580_s6 + $0x40] sm:$0xff] }
  0x8b   :  { %v413_v4 = vpack.c.bf16 %v220_v3, %v219_v2 }
  0x8d   :  { %349 = vmatpush3.msra.mxu0 %v97_v43  ;;  %414 = vmatpush3.bf16.msra.mxu1 %v413_v4 }
  0x8e   :  { %351 = vmatmul.mubr.msk.f32.vlgmr.msra.gmra.mrb[0].mxu0 %vm109_vm1, %v99_v44  ;;  %415 = vmatprep.subr.bf16.mxu1 %v440_v1 }
  0x91   :  { %417 = vmatpush3.bf16.msra.mxu1 %v416_v7 }
  0x92   :  { %418 = vmatprep.subr.bf16.mxu1 %v440_v1 }
  0x95   :  { %420 = vmatpush3.bf16.msra.mxu1 %v419_v16 }
  0x96   :  { %421 = vmatprep.subr.bf16.mxu1 %v440_v1 }
  0x99   :  { %423 = vmatpush3.bf16.msra.mxu1 %v422_v19 }
 0x161   :  { %v179_v45 = vpop.f32.mrb[0].mxu0 }
 0x162   :  { %183 = vadd.xlane.f32.xlu0 %v179_v45  ;;  %v352_v46 = vpop.f32.mrb[1].mxu0 }
 0x1ef   :  { %v184_v47 = vpop.xlane.xlu0 %183 }
 0x1f0   :  { %v185_v48 = vmul.f32 0.0078125, %v184_v47 }
 0x1f2   :  { %v186_v49 = vsub.f32 %v179_v45, %v185_v48 }
 0x1f4   :  { %v187_v50 = vmul.f32 %v186_v49, %v186_v49 }
 0x1f6   :  { %188 = vadd.xlane.f32.xlu1 %v187_v50 }
 0x207   :  { %204 = vperm.xlu1 %437, %v201_v52  }
 0x283   :  { %v189_v8 = vpop.xlane.xlu1 %188 }
 0x284   :  { %v190_v9 = vmul.f32 0.0078125, %v189_v8 }
 0x286   :  { %v191_v10 = vadd.f32 1e-05, %v190_v9 }
 0x287   :  { %v205_v21 = vpop.permute.xlu1 %204 }
 0x288   :  { %438 = vrsqrt.f32 %v191_v10 }
 0x292   :  { %v439_v12 = vpop.eup %438 }
 0x293   :  { %v194_v13 = vmul.f32 %v439_v12, %v193_v11 }
 0x295   :  { %197 = vperm.xlu0 %436, %v194_v13  }
 0x314   :  { %v198_v20 = vpop.permute.xlu0 %197 }
 0x315   :  { %v200_v22 = vmul.f32 %v198_v20, %v186_v49 }
 0x317   :  { %v207_v24 = vadd.f32 %v205_v21, %v200_v22 }
 0x319   :  { %v209_v25 = vadd.f32 %v208_v23, %v207_v24 }
 0x31b   :  { %v210_v1 = vmax.f32 %v209_v25, 0.0 }
 0x31d   :  { %386 = vmatmul.mubr.f32.vlgmr.msra.gmra.mrb[0].mxu1 %v210_v1 }
 0x3f0   :  { %v293_v26 = vpop.f32.mrb[0].mxu1 }
 0x3f1   :  { %298 = vst.msk [vmem:[%s583_s7] sm:$0xff] %vm297_vm2, %v293_v26  ;;  %v387_v27 = vpop.f32.mrb[1].mxu1 }

// kernel: _lambda_.4
= control target key start
LH: loop header
LB: loop body
LE: loop exit
PB: predicated region body
PF: predicated region fallthrough
CT: control target
= control target key end

     0   :  { %11 = vsyncpa [#allocation4], 0  ;;  %s1127_s21 = smov [#allocation3]   ;;  %s1607_s0 = inlined_call_operand.vmem [shape: f32[4,512], index: 0, kind: input, shape index: {}]   ;;  %s1608_s1 = inlined_call_operand.vmem [shape: f32[8,36], index: 1, kind: input, shape index: {}]   ;;  %s1609_s2 = inlined_call_operand.vmem [shape: f32[9,512], index: 2, kind: input, shape index: {}]   ;;  %s1610_s3 = inlined_call_operand.vmem [shape: f32[8,1], index: 3, kind: input, shape index: {}]   ;;  %s1611_s4 = inlined_call_operand.vmem [shape: f32[8,1], index: 4, kind: input, shape index: {}]   ;;  %s1612_s5 = inlined_call_operand.hbm [shape: f32[512,128], index: 5, kind: input, shape index: {}]   ;;  %s1613_s6 = inlined_call_operand.vmem [shape: f32[8,128], index: 6, kind: output, shape index: {}]  }
   0x1   :  { %s27_s22 = sshll.u32 %s1127_s21, 4  ;;  %s1103_s25 = scalar_lea.hbm %s1612_s5, 8192  ;;  %s28_s22 = int_to_ptr.vmem [resolvable:$true] %s27_s22 }
   0x2   :  { %p1104_p0 = scmp.ne.s32.totalorder %s1612_s5, %s1103_s25  ;;  %p1107_p1 = scmp.lt.u32.totalorder %s1103_s25, %s1612_s5 }
   0x4   :  { %p1109_p2 = pnand %p1107_p1, %p1104_p0 }
   0x6   :  { %1112 = shalt.err (!%p1109_p2)
}
   0x7   :  { %s1113_s30 = scalar_lea.vmem %s28_s22, 8192  ;;  %p1118_p4 = scmp.lt.s32.totalorder %s28_s22, %s28_s22 }
   0x8   :  { %p1114_p3 = scmp.ne.s32.totalorder %s28_s22, %s1113_s30  ;;  %p1119_p5 = scmp.lt.s32.totalorder %s1113_s30, %s1113_s30 }
   0xa   :  { %p1120_p6 = por %p1119_p5, %p1118_p4 }
   0xc   :  { %p1121_p7 = pnand %p1120_p6, %p1114_p3 }
   0xe   :  { %1124 = shalt.err (!%p1121_p7)
}
   0xf   :  { %s1128_s7 = smov 128   ;;  %s1129_s8 = smov 8  }
  0x10   :  { %33 = dma.hbm_to_vmem [thread:$0]  %s1612_s5, 8192, %s28_s22, [#allocation4], %s1128_s7, %s1128_s7, %s1129_s8  }
  0x11   :  { %1125 = dma.done.wait [#allocation4], 8192  }
  0x12   :  { %1126 = vsyncadd [#allocation4], 4294959104  ;;  %v61_v0 = vlaneseq  ;;  %v1203_v6 = vld [vmem:[%s1607_s0] sm:$0xff]  ;;  %v1208_v7 = vld [vmem:[%s1609_s2 + $0x8] sm:$0xff]  ;;  %s1130_s14 = smov 1   ;;  %s1131_s15 = smov 16  }
  0x13   :  { %178 = vrot.lane.b32.xlu1 %v1203_v6, %s1130_s14  ;;  %92 = vrot.lane.b32.xlu0 %v1203_v6, %s1131_s15  ;;  %v1216_v8 = vcombine.high %v1203_v6, %v1203_v6  ;;  %v1223_v10 = vld [vmem:[%s1609_s2] sm:$0xff]  ;;  %v1231_v12 = vld [vmem:[%s1607_s0 + $0x8] sm:$0xff]  ;;  %s1132_s23 = smov 17   ;;  %s1133_s24 = smov 15   ;;  %v1138_v56 = vmov 0.0   ;;  %vm460_vm8 = vcmask 1043456  }
  0x14   :  { %v1188_v1 = vshrl.u32 %v61_v0, 7  ;;  %v1251_v21 = vcombine.high %v1231_v12, %v1231_v12  ;;  %v1257_v23 = vld [vmem:[%s1609_s2 + $0x10] sm:$0xff]  ;;  %v1262_v24 = vld [vmem:[%s1609_s2 + $0x18] sm:$0xff]  ;;  %s1134_s25 = smov 127   ;;  %s1135_s26 = smov 112   ;;  %537 = vmatprep.mubr.f32.mxu0 %v1138_v56  ;;  %608 = vmatprep.mubr.f32.mxu1 %v1138_v56  ;;  %v1365_v57 = vand.u32 127, %v61_v0 }
  0x15   :  { %s1136_s27 = smov 113   ;;  %s1137_s28 = smov 111   ;;  %vm456_vm9 = vcmask 293888  }
  0x16   :  { %v1191_v2 = vsub.s32 3, %v1188_v1  ;;  %v229_v3 = vsub.s32 4, %v1188_v1  ;;  %v1195_v4 = vsub.s32 1, %v1188_v1  ;;  %v1198_v5 = vsub.s32 0, %v1188_v1 }
  0x17   :  { %v1226_v11 = vsub.s32 2, %v1188_v1  ;;  %180 = vrot.lane.b32.xlu1 %v1216_v8, %s1130_s14  ;;  %94 = vrot.lane.b32.xlu0 %v1216_v8, %s1131_s15  ;;  %v1288_v35 = vsub.s32 5, %v1188_v1  ;;  %v1295_v37 = vsub.s32 7, %v1188_v1  ;;  %v1323_v46 = vsub.s32 6, %v1188_v1 }
  0x18   :  { %v198_v9 = vrot.slane %v1208_v7, %v1191_v2  ;;  %v234_v13 = vrot.slane %v1208_v7, %v229_v3  ;;  %v112_v14 = vrot.slane %v1208_v7, %v1195_v4  ;;  %v194_v15 = vrot.slane %v1223_v10, %v1191_v2 }
  0x19   :  { %v230_v16 = vrot.slane %v1223_v10, %v229_v3  ;;  %v108_v17 = vrot.slane %v1223_v10, %v1195_v4  ;;  %v75_v18 = vrot.slane %v1208_v7, %v1198_v5  ;;  %v161_v19 = vrot.slane %v1208_v7, %v1226_v11 }
  0x1a   :  { %v116_v25 = vrot.slane %v1257_v23, %v1195_v4  ;;  %v120_v26 = vrot.slane %v1262_v24, %v1195_v4  ;;  %v238_v27 = vrot.slane %v1257_v23, %v229_v3  ;;  %v242_v28 = vrot.slane %v1262_v24, %v229_v3 }
  0x1b   :  { %v247_v20 = vcombine.low %v230_v16, %v234_v13  ;;  %v71_v29 = vrot.slane %v1223_v10, %v1198_v5  ;;  %184 = vrot.lane.b32.xlu1 %v1251_v21, %s1130_s14  ;;  %98 = vrot.lane.b32.xlu0 %v1251_v21, %s1131_s15  ;;  %v202_v32 = vrot.slane %v1257_v23, %v1191_v2  ;;  %vm186_vm0 = vcmp.lt.s32.totalorder %v1365_v57, 1 }
  0x1c   :  { %v248_v30 = vcombine.low %v238_v27, %v242_v28  ;;  %v206_v33 = vrot.slane %v1262_v24, %v1191_v2  ;;  %v157_v34 = vrot.slane %v1223_v10, %v1226_v11  ;;  %v283_v36 = vrot.slane %v1208_v7, %v1288_v35 }
  0x1d   :  { %v251_v22 = vmul.f32 %v247_v20, %v1203_v6  ;;  %v369_v38 = vrot.slane %v1208_v7, %v1295_v37  ;;  %v165_v40 = vrot.slane %v1257_v23, %v1226_v11  ;;  %v169_v41 = vrot.slane %v1262_v24, %v1226_v11 }
  0x1e   :  { %v252_v31 = vmul.f32 %v248_v30, %v1231_v12  ;;  %v79_v42 = vrot.slane %v1257_v23, %v1198_v5  ;;  %v83_v43 = vrot.slane %v1262_v24, %v1198_v5  ;;  %v365_v44 = vrot.slane %v1223_v10, %v1295_v37 }
  0x1f   :  { %259 = vst [vmem:[#allocation2 + $0x40] sm:$0xf] %v251_v22  ;;  %55 = vrot.lane.b32.xlu1 %v1216_v8, %s1132_s23  ;;  %53 = vrot.lane.b32.xlu0 %v1203_v6, %s1132_s23  ;;  %v255_v39 = vcombine.high %v251_v22, %v251_v22  ;;  %v279_v45 = vrot.slane %v1223_v10, %v1288_v35  ;;  %vm100_vm1 = vcmp.lt.s32.totalorder %v1365_v57, 16  ;;  %vm63_vm2 = vcmp.lt.s32.totalorder %v1365_v57, 17 }
  0x20   :  { %261 = vst [vmem:[#allocation2 + $0x50] sm:$0xf] %v252_v31  ;;  %v332_v47 = vrot.slane %v1208_v7, %v1323_v46  ;;  %v328_v48 = vrot.slane %v1223_v10, %v1323_v46  ;;  %v287_v49 = vrot.slane %v1257_v23, %v1288_v35  ;;  %v291_v50 = vrot.slane %v1262_v24, %v1288_v35 }
  0x21   :  { %260 = vst [vmem:[#allocation2 + $0x48] sm:$0xf] %v255_v39  ;;  %v336_v51 = vrot.slane %v1257_v23, %v1323_v46  ;;  %v340_v52 = vrot.slane %v1262_v24, %v1323_v46  ;;  %v373_v53 = vrot.slane %v1257_v23, %v1295_v37  ;;  %v377_v54 = vrot.slane %v1262_v24, %v1295_v37  ;;  %v906_v37 = vld [vmem:[%s1609_s2 + $0x30] ss:$0 sm:$0xff] }
  0x22   :  { %v256_v55 = vcombine.high %v252_v31, %v252_v31  ;;  %vm149_vm3 = vcmp.lt.s32.totalorder %v1365_v57, 15  ;;  %vm271_vm4 = vcmp.lt.s32.totalorder %v1365_v57, 127  ;;  %vm357_vm5 = vcmp.lt.s32.totalorder %v1365_v57, 112 }
  0x23   :  { %143 = vrot.lane.b32.xlu1 %v1216_v8, %s1133_s24  ;;  %141 = vrot.lane.b32.xlu0 %v1203_v6, %s1133_s24  ;;  %vm320_vm6 = vcmp.lt.s32.totalorder %v1365_v57, 113  ;;  %vm406_vm7 = vcmp.lt.s32.totalorder %v1365_v57, 111 }
  0x24   :  { %262 = vst [vmem:[#allocation2 + $0x58] sm:$0xf] %v256_v55 }
  0x27   :  { %96 = vrot.lane.b32.xlu1 %v1231_v12, %s1131_s15  ;;  %59 = vrot.lane.b32.xlu0 %v1251_v21, %s1132_s23 }
  0x2b   :  { %182 = vrot.lane.b32.xlu1 %v1231_v12, %s1130_s14  ;;  %147 = vrot.lane.b32.xlu0 %v1251_v21, %s1133_s24 }
  0x2f   :  { %267 = vrot.lane.b32.xlu1 %v1231_v12, %s1134_s25  ;;  %265 = vrot.lane.b32.xlu0 %v1216_v8, %s1134_s25 }
  0x33   :  { %353 = vrot.lane.b32.xlu1 %v1231_v12, %s1135_s26  ;;  %351 = vrot.lane.b32.xlu0 %v1216_v8, %s1135_s26 }
  0x37   :  { %145 = vrot.lane.b32.xlu1 %v1231_v12, %s1133_s24  ;;  %57 = vrot.lane.b32.xlu0 %v1231_v12, %s1132_s23 }
  0x3b   :  { %349 = vrot.lane.b32.xlu1 %v1203_v6, %s1135_s26  ;;  %263 = vrot.lane.b32.xlu0 %v1203_v6, %s1134_s25 }
  0x3f   :  { %316 = vrot.lane.b32.xlu1 %v1231_v12, %s1136_s27  ;;  %314 = vrot.lane.b32.xlu0 %v1216_v8, %s1136_s27 }
  0x43   :  { %312 = vrot.lane.b32.xlu1 %v1203_v6, %s1136_s27  ;;  %269 = vrot.lane.b32.xlu0 %v1251_v21, %s1134_s25 }
  0x47   :  { %318 = vrot.lane.b32.xlu1 %v1251_v21, %s1136_s27  ;;  %355 = vrot.lane.b32.xlu0 %v1251_v21, %s1135_s26 }
  0x4b   :  { %402 = vrot.lane.b32.xlu1 %v1231_v12, %s1137_s28  ;;  %400 = vrot.lane.b32.xlu0 %v1216_v8, %s1137_s28 }
  0x4f   :  { %404 = vrot.lane.b32.xlu1 %v1251_v21, %s1137_s28  ;;  %398 = vrot.lane.b32.xlu0 %v1203_v6, %s1137_s28 }
  0x85   :  { %v179_v58 = vpop.permute.xlu1 %178  ;;  %v93_v59 = vpop.permute.xlu0 %92 }
  0x89   :  { %v181_v60 = vpop.permute.xlu1 %180  ;;  %v95_v61 = vpop.permute.xlu0 %94 }
  0x8a   :  { %v189_v62 = vsel %vm186_vm0, %v179_v58, %v181_v60  ;;  %v103_v63 = vsel %vm100_vm1, %v93_v59, %v95_v61 }
  0x8b   :  { %v208_v1 = vmul.f32 %v198_v9, %v189_v62  ;;  %v122_v0 = vmul.f32 %v112_v14, %v103_v63 }
  0x8d   :  { %v216_v3 = vrot.slane %v208_v1, 4  ;;  %v130_v6 = vrot.slane %v122_v0, 4  ;;  %v185_v8 = vpop.permute.xlu1 %184  ;;  %v99_v12 = vpop.permute.xlu0 %98 }
  0x8e   :  { %v190_v13 = vsel %vm186_vm0, %v185_v8, %v179_v58  ;;  %v104_v16 = vsel %vm100_vm1, %v99_v12, %v93_v59 }
  0x8f   :  { %224 = vst [vmem:[#allocation2 + $0x28] sm:$0xf0] %v216_v3  ;;  %138 = vst [vmem:[#allocation2 + $0x8] sm:$0xf0] %v130_v6  ;;  %v207_v9 = vmul.f32 %v194_v15, %v190_v13  ;;  %v121_v14 = vmul.f32 %v108_v17, %v104_v16 }
  0x91   :  { %v215_v20 = vrot.slane %v207_v9, 4  ;;  %v129_v21 = vrot.slane %v121_v14, 4  ;;  %v1390_v22 = vpop.permute.xlu1 %55  ;;  %v54_v27 = vpop.permute.xlu0 %53 }
  0x92   :  { %v66_v28 = vsel %vm63_vm2, %v54_v27, %v1390_v22 }
  0x93   :  { %223 = vst [vmem:[#allocation2 + $0x20] sm:$0xf0] %v215_v20  ;;  %137 = vst [vmem:[#allocation2] sm:$0xf0] %v129_v21  ;;  %v85_v15 = vmul.f32 %v75_v18, %v66_v28 }
  0x95   :  { %89 = vst [vmem:[#allocation2 + $0x8] sm:$0xf] %v85_v15  ;;  %v144_v17 = vpop.permute.xlu1 %143  ;;  %v142_v30 = vpop.permute.xlu0 %141 }
  0x96   :  { %v152_v31 = vsel %vm149_vm3, %v142_v30, %v144_v17 }
  0x97   :  { %v171_v39 = vmul.f32 %v161_v19, %v152_v31 }
  0x99   :  { %175 = vst [vmem:[#allocation2 + $0x28] sm:$0xf] %v171_v39  ;;  %v97_v55 = vpop.permute.xlu1 %96  ;;  %v60_v56 = vpop.permute.xlu0 %59 }
  0x9a   :  { %v101_v58 = vsel %vm100_vm1, %v97_v55, %v99_v12  ;;  %v102_v18 = vsel %vm100_vm1, %v95_v61, %v97_v55  ;;  %v67_v59 = vsel %vm63_vm2, %v60_v56, %v54_v27 }
  0x9b   :  { %v123_v62 = vmul.f32 %v116_v25, %v102_v18  ;;  %v124_v19 = vmul.f32 %v120_v26, %v101_v58  ;;  %v84_v63 = vmul.f32 %v71_v29, %v67_v59 }
  0x9d   :  { %v131_v1 = vrot.slane %v123_v62, 4  ;;  %v132_v0 = vrot.slane %v124_v19, 4  ;;  %88 = vst [vmem:[#allocation2] sm:$0xf] %v84_v63  ;;  %v183_v3 = vpop.permute.xlu1 %182  ;;  %v148_v61 = vpop.permute.xlu0 %147 }
  0x9e   :  { %v187_v6 = vsel %vm186_vm0, %v183_v3, %v185_v8  ;;  %v188_v12 = vsel %vm186_vm0, %v181_v60, %v183_v3  ;;  %v153_v25 = vsel %vm149_vm3, %v148_v61, %v142_v30  ;;  %v437_v60 = vld [vmem:[#allocation2 + $0x8] sm:$0xff] }
  0x9f   :  { %139 = vst [vmem:[#allocation2 + $0x10] sm:$0xf0] %v131_v1  ;;  %140 = vst [vmem:[#allocation2 + $0x18] sm:$0xf0] %v132_v0  ;;  %v209_v4 = vmul.f32 %v202_v32, %v188_v12  ;;  %v210_v26 = vmul.f32 %v206_v33, %v187_v6  ;;  %v170_v29 = vmul.f32 %v157_v34, %v153_v25 }
  0xa0   :  { %v441_v8 = vld [vmem:[#allocation2 + $0x28] sm:$0xff] }
  0xa1   :  { %v217_v13 = vrot.slane %v209_v4, 4  ;;  %v218_v16 = vrot.slane %v210_v26, 4  ;;  %174 = vst [vmem:[#allocation2 + $0x20] sm:$0xf] %v170_v29  ;;  %v268_v9 = vpop.permute.xlu1 %267  ;;  %v266_v14 = vpop.permute.xlu0 %265  ;;  %v984_v20 = vpack.c.bf16 %v441_v8, %v437_v60 }
  0xa2   :  { %v273_v32 = vsel %vm271_vm4, %v266_v14, %v268_v9 }
  0xa3   :  { %225 = vst [vmem:[#allocation2 + $0x30] sm:$0xf0] %v217_v13  ;;  %226 = vst [vmem:[#allocation2 + $0x38] sm:$0xf0] %v218_v16  ;;  %v293_v2 = vmul.f32 %v283_v36, %v273_v32  ;;  %985 = vmatprep.subr.bf16.mxu0 %v984_v20 }
  0xa4   :  { %v436_v15 = vld [vmem:[#allocation2] sm:$0xff] }
  0xa5   :  { %v301_v33 = vrot.slane %v293_v2, 4  ;;  %v1441_v34 = vpop.permute.xlu1 %353  ;;  %v352_v21 = vpop.permute.xlu0 %351 }
  0xa6   :  { %v359_v27 = vsel %vm357_vm5, %v352_v21, %v1441_v34 }
  0xa7   :  { %309 = vst [vmem:[#allocation2 + $0x48] sm:$0xf0] %v301_v33  ;;  %v379_v28 = vmul.f32 %v369_v38, %v359_v27 }
  0xa8   :  { %v440_v30 = vld [vmem:[#allocation2 + $0x20] sm:$0xff] }
  0xa9   :  { %v387_v31 = vrot.slane %v379_v28, 4  ;;  %v146_v36 = vpop.permute.xlu1 %145  ;;  %v58_v39 = vpop.permute.xlu0 %57  ;;  %v986_v55 = vpack.c.bf16 %v440_v30, %v436_v15 }
  0xaa   :  { %v150_v58 = vsel %vm149_vm3, %v146_v36, %v148_v61  ;;  %v151_v18 = vsel %vm149_vm3, %v144_v17, %v146_v36  ;;  %v64_v59 = vsel %vm63_vm2, %v58_v39, %v60_v56  ;;  %v65_v62 = vsel %vm63_vm2, %v1390_v22, %v58_v39 }
  0xab   :  { %395 = vst [vmem:[#allocation2 + $0x68] sm:$0xf0] %v387_v31  ;;  %v172_v38 = vmul.f32 %v165_v40, %v151_v18  ;;  %v173_v19 = vmul.f32 %v169_v41, %v150_v58  ;;  %v86_v17 = vmul.f32 %v79_v42, %v65_v62  ;;  %v87_v56 = vmul.f32 %v83_v43, %v64_v59 }
  0xac   :  { %987 = vmatpush1.bf16.msra.mxu0 %v986_v55 }
  0xad   :  { %176 = vst [vmem:[#allocation2 + $0x30] sm:$0xf] %v172_v38  ;;  %177 = vst [vmem:[#allocation2 + $0x38] sm:$0xf] %v173_v19  ;;  %v350_v22 = vpop.permute.xlu1 %349  ;;  %v264_v63 = vpop.permute.xlu0 %263 }
  0xae   :  { %90 = vst [vmem:[#allocation2 + $0x10] sm:$0xf] %v86_v17  ;;  %91 = vst [vmem:[#allocation2 + $0x18] sm:$0xf] %v87_v56  ;;  %v360_v40 = vsel %vm357_vm5, %v350_v22, %v352_v21  ;;  %v274_v11 = vsel %vm271_vm4, %v264_v63, %v266_v14  ;;  %v905_v21 = vld [vmem:[%s1609_s2 + $0x28] ss:$0 sm:$0xff] }
  0xaf   :  { %v378_v41 = vmul.f32 %v365_v44, %v360_v40  ;;  %v292_v5 = vmul.f32 %v279_v45, %v274_v11  ;;  %v445_v27 = vld [vmem:[#allocation2 + $0x48] sm:$0xff] }
  0xb1   :  { %v386_v42 = vrot.slane %v378_v41, 4  ;;  %v300_v43 = vrot.slane %v292_v5, 4  ;;  %v317_v1 = vpop.permute.xlu1 %316  ;;  %v315_v0 = vpop.permute.xlu0 %314 }
  0xb2   :  { %v322_v3 = vsel %vm320_vm6, %v315_v0, %v317_v1 }
  0xb3   :  { %394 = vst [vmem:[#allocation2 + $0x60] sm:$0xf0] %v386_v42  ;;  %308 = vst [vmem:[#allocation2 + $0x40] sm:$0xf0] %v300_v43  ;;  %v342_v61 = vmul.f32 %v332_v47, %v322_v3  ;;  %v435_v42 = vld [vmem:[%s1608_s1] sm:$0xff] }
  0xb4   :  { %v443_v6 = vld [vmem:[#allocation2 + $0x38] sm:$0xff]  ;;  %v442_v26 = vld [vmem:[#allocation2 + $0x30] sm:$0xff] }
  0xb5   :  { %v439_v44 = vld [vmem:[#allocation2 + $0x18] sm:$0xff]  ;;  %v438_v12 = vld [vmem:[#allocation2 + $0x10] sm:$0xff]  ;;  %346 = vst [vmem:[#allocation2 + $0x68] sm:$0xf] %v342_v61  ;;  %v313_v45 = vpop.permute.xlu1 %312  ;;  %v270_v25 = vpop.permute.xlu0 %269 }
  0xb6   :  { %v992_v4 = vpack.c.bf16 %v443_v6, %v439_v44  ;;  %v323_v29 = vsel %vm320_vm6, %v313_v45, %v315_v0  ;;  %v272_v60 = vsel %vm271_vm4, %v268_v9, %v270_v25  ;;  %v275_v8 = vsel %vm271_vm4, %v270_v25, %v264_v63 }
  0xb7   :  { %v994_v13 = vpack.c.bf16 %v442_v26, %v438_v12  ;;  %v341_v7 = vmul.f32 %v328_v48, %v323_v29  ;;  %v294_v47 = vmul.f32 %v287_v49, %v272_v60  ;;  %v295_v16 = vmul.f32 %v291_v50, %v275_v8 }
  0xb8   :  { %993 = vmatprep.subr.bf16.mxu1 %v992_v4 }
  0xb9   :  { %995 = vmatpush1.bf16.msra.mxu1 %v994_v13  ;;  %345 = vst [vmem:[#allocation2 + $0x60] sm:$0xf] %v341_v7  ;;  %v302_v9 = vrot.slane %v294_v47, 4  ;;  %v303_v14 = vrot.slane %v295_v16, 4  ;;  %v319_v20 = vpop.permute.xlu1 %318  ;;  %v356_v32 = vpop.permute.xlu0 %355 }
  0xba   :  { %v321_v10 = vsel %vm320_vm6, %v317_v1, %v319_v20  ;;  %v324_v48 = vsel %vm320_vm6, %v319_v20, %v313_v45  ;;  %v358_v35 = vsel %vm357_vm5, %v1441_v34, %v356_v32  ;;  %v361_v49 = vsel %vm357_vm5, %v356_v32, %v350_v22  ;;  %v444_v31 = vld [vmem:[#allocation2 + $0x40] sm:$0xff] }
  0xbb   :  { %310 = vst [vmem:[#allocation2 + $0x50] sm:$0xf0] %v302_v9  ;;  %311 = vst [vmem:[#allocation2 + $0x58] sm:$0xf0] %v303_v14  ;;  %v343_v50 = vmul.f32 %v336_v51, %v321_v10  ;;  %v344_v2 = vmul.f32 %v340_v52, %v324_v48  ;;  %v380_v33 = vmul.f32 %v373_v53, %v358_v35  ;;  %v904_v53 = vld [vmem:[%s1609_s2 + $0x20] ss:$0 sm:$0xff] }
  0xbc   :  { %v381_v34 = vmul.f32 %v377_v54, %v361_v49  ;;  %v449_v28 = vld [vmem:[#allocation2 + $0x68] sm:$0xff]  ;;  %v907_v54 = vld [vmem:[%s1609_s2 + $0x38] ss:$0 sm:$0xff]  ;;  %v1139_v10 = vmov 0   ;;  %v648_v48 = vld [vmem:[%s1611_s4] sm:$0xff] }
  0xbd   :  { %347 = vst [vmem:[#allocation2 + $0x70] sm:$0xf] %v343_v50  ;;  %348 = vst [vmem:[#allocation2 + $0x78] sm:$0xf] %v344_v2  ;;  %v388_v51 = vrot.slane %v380_v33, 4  ;;  %v403_v46 = vpop.permute.xlu1 %402  ;;  %v401_v52 = vpop.permute.xlu0 %400  ;;  %v988_v30 = vpack.c.bf16 %v449_v28, %v445_v27  ;;  %1077 = vset.pattern.permute.xlu0 %v1139_v10  ;;  %1078 = vset.pattern.permute.xlu1 %v1139_v10  ;;  %v637_v2 = vld [vmem:[%s1610_s3] sm:$0xff] }
  0xbe   :  { %v389_v15 = vrot.slane %v381_v34, 4  ;;  %v408_v23 = vsel %vm406_vm7, %v401_v52, %v403_v46 }
  0xbf   :  { %396 = vst [vmem:[#allocation2 + $0x70] sm:$0xf0] %v388_v51  ;;  %v428_v24 = vmul.f32 %v905_v21, %v408_v23  ;;  %989 = vmatprep.subr.bf16.mxu0 %v988_v30 }
  0xc0   :  { %397 = vst [vmem:[#allocation2 + $0x78] sm:$0xf0] %v389_v15  ;;  %v448_v36 = vld [vmem:[#allocation2 + $0x60] sm:$0xff] }
  0xc1   :  { %432 = vst [vmem:[#allocation2 + $0x88] sm:$0xf] %v428_v24  ;;  %v405_v39 = vpop.permute.xlu1 %404  ;;  %v399_v55 = vpop.permute.xlu0 %398  ;;  %v990_v58 = vpack.c.bf16 %v448_v36, %v444_v31 }
  0xc2   :  { %v407_v18 = vsel %vm406_vm7, %v403_v46, %v405_v39  ;;  %v409_v59 = vsel %vm406_vm7, %v399_v55, %v401_v52  ;;  %v410_v62 = vsel %vm406_vm7, %v405_v39, %v399_v55  ;;  %v447_v56 = vld [vmem:[#allocation2 + $0x58] sm:$0xff]  ;;  %v446_v63 = vld [vmem:[#allocation2 + $0x50] sm:$0xff]  ;;  %v710_v55 = vld [vmem:[#allocation3 + $0x80] sm:$0xff] }
  0xc3   :  { %v429_v38 = vmul.f32 %v906_v37, %v407_v18  ;;  %v427_v19 = vmul.f32 %v904_v53, %v409_v59  ;;  %v430_v17 = vmul.f32 %v907_v54, %v410_v62  ;;  %991 = vmatpush1.bf16.msra.mxu0 %v990_v58  ;;  %v711_v58 = vld [vmem:[#allocation3 + $0x88] sm:$0xff]  ;;  %v742_v18 = vld [vmem:[#allocation3 + $0x180] sm:$0xff] }
  0xc4   :  { %v1000_v59 = vpack.c.bf16 %v711_v58, %v710_v55  ;;  %v743_v62 = vld [vmem:[#allocation3 + $0x188] sm:$0xff]  ;;  %v734_v55 = vld [vmem:[#allocation3 + $0x140] sm:$0xff] }
  0xc5   :  { %433 = vst [vmem:[#allocation2 + $0x90] sm:$0xf] %v429_v38  ;;  %431 = vst [vmem:[#allocation2 + $0x80] sm:$0xf] %v427_v19  ;;  %v694_v38 = vld [vmem:[#allocation3] sm:$0xff]  ;;  %v695_v19 = vld [vmem:[#allocation3 + $0x8] sm:$0xff] }
  0xc6   :  { %434 = vst [vmem:[#allocation2 + $0x98] sm:$0xf] %v430_v17  ;;  %v450_v40 = vld [vmem:[#allocation2 + $0x70] sm:$0xff]  ;;  %v1032_v17 = vpack.c.bf16 %v743_v62, %v742_v18  ;;  %v735_v18 = vld [vmem:[#allocation3 + $0x148] sm:$0xff]  ;;  %v721_v62 = vld [vmem:[#allocation3 + $0xd8] sm:$0xff] }
  0xc7   :  { %v451_v22 = vld [vmem:[#allocation2 + $0x78] sm:$0xff]  ;;  %v998_v41 = vpack.c.bf16 %v450_v40, %v446_v63  ;;  %v727_v63 = vld [vmem:[#allocation3 + $0x108] sm:$0xff]  ;;  %v712_v40 = vld [vmem:[#allocation3 + $0x90] sm:$0xff] }
  0xc8   :  { %v996_v11 = vpack.c.bf16 %v451_v22, %v447_v56  ;;  %v453_v5 = vld [vmem:[#allocation2 + $0x88] sm:$0xf]  ;;  %v1002_v56 = vpack.c.bf16 %v695_v19, %v694_v38  ;;  %v726_v22 = vld [vmem:[#allocation3 + $0x100] sm:$0xff]  ;;  %v752_v38 = vld [vmem:[#allocation3 + $0x1d0] sm:$0xff] }
  0xc9   :  { %908 = vmatprep.subr.msk.mxu0 %vm460_vm8, %v453_v5  ;;  %v744_v5 = vld [vmem:[#allocation3 + $0x190] sm:$0xff]  ;;  %v753_v19 = vld [vmem:[#allocation3 + $0x1d8] sm:$0xff] }
  0xca   :  { %997 = vmatprep.subr.bf16.mxu1 %v996_v11  ;;  %v1034_v11 = vpack.c.bf16 %v727_v63, %v726_v22  ;;  %v704_v63 = vld [vmem:[#allocation3 + $0x50] sm:$0xff] }
  0xcb   :  { %999 = vmatpush1.bf16.msra.mxu1 %v998_v41  ;;  %v713_v41 = vld [vmem:[#allocation3 + $0x98] sm:$0xff] }
  0xcc   :  { %v452_v43 = vld [vmem:[#allocation2 + $0x80] sm:$0xf]  ;;  %v454_v0 = vld [vmem:[#allocation2 + $0x90] sm:$0xf] }
  0xcd   :  { %v455_v1 = vld [vmem:[#allocation2 + $0x98] sm:$0xf]  ;;  %909 = vmatpush1.msk.msra.mxu0 %vm460_vm8, %v452_v43  ;;  %v1004_v43 = vpack.c.bf16 %v713_v41, %v712_v40  ;;  %v736_v41 = vld [vmem:[#allocation3 + $0x150] sm:$0xff] }
  0xce   :  { %911 = vmatprep.subr.msk.mxu1 %vm460_vm8, %v455_v1  ;;  %910 = vmatmul.mubr.msk.f32.vlgmr.msra.gmra.mrb[0].mxu0 %vm456_vm9, %v435_v42  ;;  %v705_v40 = vld [vmem:[#allocation3 + $0x58] sm:$0xff] }
  0xcf   :  { %912 = vmatpush1.msk.msra.mxu1 %vm460_vm8, %v454_v0  ;;  %1001 = vmatprep.subr.bf16.mxu0 %v1000_v59  ;;  %v696_v0 = vld [vmem:[#allocation3 + $0x10] sm:$0xff] }
  0xd0   :  { %913 = vmatmul.mubr.msk.f32.vlgmr.msra.gmra.mrb[0].mxu1 %vm456_vm9, %v435_v42  ;;  %v745_v42 = vld [vmem:[#allocation3 + $0x198] sm:$0xff]  ;;  %1033 = vmatprep.subr.bf16.mxu1 %v1032_v17  ;;  %v720_v59 = vld [vmem:[#allocation3 + $0xd0] sm:$0xff] }
  0xd1   :  { %1003 = vmatpush3.bf16.msra.mxu0 %v1002_v56  ;;  %v1036_v1 = vpack.c.bf16 %v745_v42, %v744_v5  ;;  %1035 = vmatpush3.bf16.msra.mxu1 %v1034_v11  ;;  %v1050_v56 = vpack.c.bf16 %v735_v18, %v734_v55  ;;  %v1020_v22 = vpack.c.bf16 %v721_v62, %v720_v59  ;;  %v737_v5 = vld [vmem:[#allocation3 + $0x158] sm:$0xff] }
  0xd2   :  { %1005 = vmatprep.subr.bf16.mxu0 %v1004_v43  ;;  %v1052_v11 = vpack.c.bf16 %v753_v19, %v752_v38  ;;  %v1022_v42 = vpack.c.bf16 %v705_v40, %v704_v63  ;;  %v1054_v43 = vpack.c.bf16 %v737_v5, %v736_v41 }
  0xd3   :  { %1037 = vmatprep.subr.bf16.mxu1 %v1036_v1  ;;  %v722_v1 = vld [vmem:[#allocation3 + $0xe0] sm:$0xff] }
 0x1a1   :  { %v539_v3 = vpop.f32.mrb[0].mxu0 }
 0x1a2   :  { %v541_v61 = vpop.f32.mrb[1].mxu0 }
 0x1a3   :  { %v610_v44 = vpop.f32.mrb[0].mxu1  ;;  %v615_v6 = vadd.f32 %v541_v61, %v539_v3 }
 0x1a4   :  { %v612_v12 = vpop.f32.mrb[1].mxu1 }
 0x1a5   :  { %v616_v45 = vadd.f32 %v615_v6, %v610_v44  ;;  %v729_v6 = vld [vmem:[#allocation3 + $0x118] sm:$0xff] }
 0x1a7   :  { %v617_v25 = vadd.f32 %v616_v45, %v612_v12  ;;  %v715_v45 = vld [vmem:[#allocation3 + $0xa8] sm:$0xff] }
 0x1a9   :  { %618 = vadd.xlane.f32.xlu0 %v617_v25 }
 0x236   :  { %v619_v4 = vpop.xlane.xlu0 %618 }
 0x237   :  { %v620_v26 = vmul.f32 0.001953125, %v619_v4 }
 0x239   :  { %v621_v29 = vsub.f32 %v539_v3, %v620_v26  ;;  %v622_v60 = vsub.f32 %v541_v61, %v620_v26  ;;  %v623_v8 = vsub.f32 %v610_v44, %v620_v26  ;;  %v624_v13 = vsub.f32 %v612_v12, %v620_v26  ;;  %v697_v3 = vld [vmem:[#allocation3 + $0x18] sm:$0xff]  ;;  %v728_v61 = vld [vmem:[#allocation3 + $0x110] sm:$0xff]  ;;  %v714_v12 = vld [vmem:[#allocation3 + $0xa0] sm:$0xff] }
 0x23a   :  { %v1006_v44 = vpack.c.bf16 %v697_v3, %v696_v0  ;;  %v1038_v25 = vpack.c.bf16 %v729_v6, %v728_v61  ;;  %v1008_v4 = vpack.c.bf16 %v715_v45, %v714_v12  ;;  %v746_v26 = vld [vmem:[#allocation3 + $0x1a0] sm:$0xff]  ;;  %v723_v0 = vld [vmem:[#allocation3 + $0xe8] sm:$0xff] }
 0x23b   :  { %v625_v7 = vmul.f32 %v621_v29, %v621_v29  ;;  %v626_v47 = vmul.f32 %v622_v60, %v622_v60  ;;  %v627_v16 = vmul.f32 %v623_v8, %v623_v8  ;;  %v628_v14 = vmul.f32 %v624_v13, %v624_v13  ;;  %v754_v3 = vld [vmem:[#allocation3 + $0x1e0] sm:$0xff]  ;;  %v755_v6 = vld [vmem:[#allocation3 + $0x1e8] sm:$0xff] }
 0x23c   :  { %1007 = vmatpush3.bf16.msra.mxu0 %v1006_v44  ;;  %1039 = vmatpush3.bf16.msra.mxu1 %v1038_v25  ;;  %v1024_v44 = vpack.c.bf16 %v723_v0, %v722_v1  ;;  %v706_v12 = vld [vmem:[#allocation3 + $0x60] sm:$0xff]  ;;  %v707_v45 = vld [vmem:[#allocation3 + $0x68] sm:$0xff] }
 0x23d   :  { %v629_v9 = vadd.f32 %v626_v47, %v625_v7  ;;  %v730_v7 = vld [vmem:[#allocation3 + $0x120] sm:$0xff]  ;;  %v731_v47 = vld [vmem:[#allocation3 + $0x128] sm:$0xff]  ;;  %1009 = vmatprep.subr.bf16.mxu0 %v1008_v4 }
 0x23f   :  { %v630_v20 = vadd.f32 %v629_v9, %v627_v16  ;;  %v716_v9 = vld [vmem:[#allocation3 + $0xb0] sm:$0xff] }
 0x241   :  { %v631_v32 = vadd.f32 %v630_v20, %v628_v14  ;;  %v717_v14 = vld [vmem:[#allocation3 + $0xb8] sm:$0xff]  ;;  %v748_v20 = vld [vmem:[#allocation3 + $0x1b0] sm:$0xff] }
 0x242   :  { %v1012_v10 = vpack.c.bf16 %v717_v14, %v716_v9 }
 0x243   :  { %632 = vadd.xlane.f32.xlu1 %v631_v32  ;;  %v1042_v32 = vpack.c.bf16 %v731_v47, %v730_v7  ;;  %v724_v7 = vld [vmem:[#allocation3 + $0xf0] sm:$0xff]  ;;  %v725_v47 = vld [vmem:[#allocation3 + $0xf8] sm:$0xff] }
 0x254   :  { %651 = vperm.xlu1 %1078, %v648_v48   ;;  %v749_v48 = vld [vmem:[#allocation3 + $0x1b8] sm:$0xff] }
 0x2d0   :  { %v633_v35 = vpop.xlane.xlu1 %632 }
 0x2d1   :  { %v634_v49 = vmul.f32 0.001953125, %v633_v35  ;;  %v700_v35 = vld [vmem:[#allocation3 + $0x30] sm:$0xff] }
 0x2d3   :  { %v635_v50 = vadd.f32 1e-05, %v634_v49  ;;  %v701_v49 = vld [vmem:[#allocation3 + $0x38] sm:$0xff] }
 0x2d4   :  { %v652_v27 = vpop.permute.xlu1 %651 }
 0x2d5   :  { %1101 = vrsqrt.f32 %v635_v50  ;;  %v1044_v50 = vpack.c.bf16 %v749_v48, %v748_v20  ;;  %v1028_v20 = vpack.c.bf16 %v725_v47, %v724_v7  ;;  %v709_v48 = vld [vmem:[#allocation3 + $0x78] sm:$0xff] }
 0x2df   :  { %v1102_v33 = vpop.eup %1101 }
 0x2e0   :  { %v638_v34 = vmul.f32 %v1102_v33, %v637_v2  ;;  %v732_v2 = vld [vmem:[#allocation3 + $0x130] sm:$0xff]  ;;  %v733_v33 = vld [vmem:[#allocation3 + $0x138] sm:$0xff] }
 0x2e2   :  { %641 = vperm.xlu0 %1077, %v638_v34   ;;  %v718_v34 = vld [vmem:[#allocation3 + $0xc0] sm:$0xff] }
 0x361   :  { %v642_v21 = vpop.permute.xlu0 %641 }
 0x362   :  { %v644_v28 = vmul.f32 %v642_v21, %v621_v29  ;;  %v645_v51 = vmul.f32 %v642_v21, %v622_v60  ;;  %v646_v15 = vmul.f32 %v642_v21, %v623_v8  ;;  %v647_v46 = vmul.f32 %v642_v21, %v624_v13  ;;  %v747_v29 = vld [vmem:[#allocation3 + $0x1a8] sm:$0xff]  ;;  %v698_v60 = vld [vmem:[#allocation3 + $0x20] sm:$0xff] }
 0x363   :  { %v1040_v8 = vpack.c.bf16 %v747_v29, %v746_v26  ;;  %v699_v13 = vld [vmem:[#allocation3 + $0x28] sm:$0xff]  ;;  %v1056_v26 = vpack.c.bf16 %v755_v6, %v754_v3  ;;  %v1026_v29 = vpack.c.bf16 %v707_v45, %v706_v12 }
 0x364   :  { %v1556_v52 = vadd.f32 %v652_v27, %v644_v28  ;;  %v1558_v30 = vadd.f32 %v652_v27, %v645_v51  ;;  %v1560_v23 = vadd.f32 %v652_v27, %v646_v15  ;;  %v1562_v24 = vadd.f32 %v652_v27, %v647_v46  ;;  %v719_v21 = vld [vmem:[#allocation3 + $0xc8] sm:$0xff]  ;;  %v750_v27 = vld [vmem:[#allocation3 + $0x1c0] sm:$0xff] }
 0x365   :  { %v1010_v16 = vpack.c.bf16 %v699_v13, %v698_v60  ;;  %1041 = vmatprep.subr.bf16.mxu1 %v1040_v8  ;;  %v751_v28 = vld [vmem:[#allocation3 + $0x1c8] sm:$0xff]  ;;  %v1014_v51 = vpack.c.bf16 %v701_v49, %v700_v35  ;;  %v1046_v15 = vpack.c.bf16 %v733_v33, %v732_v2  ;;  %v1016_v46 = vpack.c.bf16 %v719_v21, %v718_v34  ;;  %v738_v60 = vld [vmem:[#allocation3 + $0x160] sm:$0xff]  ;;  %v740_v33 = vld [vmem:[#allocation3 + $0x170] sm:$0xff] }
 0x366   :  { %v658_v37 = vmax.f32 %v1556_v52, 0.0  ;;  %v659_v53 = vmax.f32 %v1558_v30, 0.0  ;;  %v660_v31 = vmax.f32 %v1560_v23, 0.0  ;;  %v661_v36 = vmax.f32 %v1562_v24, 0.0  ;;  %1043 = vmatpush3.bf16.msra.mxu1 %v1042_v32  ;;  %v739_v8 = vld [vmem:[#allocation3 + $0x168] sm:$0xff]  ;;  %v757_v32 = vld [vmem:[#allocation3 + $0x1f8] sm:$0xff] }
 0x367   :  { %1011 = vmatpush3.bf16.msra.mxu0 %v1010_v16  ;;  %1045 = vmatprep.subr.bf16.mxu1 %v1044_v50  ;;  %v1048_v58 = vpack.c.bf16 %v751_v28, %v750_v27  ;;  %v1058_v13 = vpack.c.bf16 %v739_v8, %v738_v60  ;;  %v756_v16 = vld [vmem:[#allocation3 + $0x1f0] sm:$0xff]  ;;  %v741_v34 = vld [vmem:[#allocation3 + $0x178] sm:$0xff] }
 0x368   :  { %v1079_v54 = vpack.i.bf16 %v659_v53, %v658_v37  ;;  %v1084_v39 = vpack.i.bf16 %v661_v36, %v660_v31  ;;  %1013 = vmatprep.subr.bf16.mxu0 %v1012_v10  ;;  %v708_v10 = vld [vmem:[#allocation3 + $0x70] sm:$0xff]  ;;  %v1060_v50 = vpack.c.bf16 %v757_v32, %v756_v16  ;;  %v1062_v21 = vpack.c.bf16 %v741_v34, %v740_v33 }
 0x369   :  { %v1030_v2 = vpack.c.bf16 %v709_v48, %v708_v10 }
 0x36a   :  { %1080 = vrot.lane.b32.xlu1 %v1079_v54, %s1134_s25  ;;  %v702_v54 = vld [vmem:[#allocation3 + $0x40] sm:$0xff]  ;;  %1047 = vmatpush3.bf16.msra.mxu1 %v1046_v15 }
 0x36b   :  { %1015 = vmatpush3.bf16.msra.mxu0 %v1014_v51  ;;  %1049 = vmatprep.subr.bf16.mxu1 %v1048_v58 }
 0x36c   :  { %1017 = vmatprep.subr.bf16.mxu0 %v1016_v46 }
 0x36e   :  { %1085 = vrot.lane.b32.xlu1 %v1084_v39, %s1134_s25  ;;  %v703_v39 = vld [vmem:[#allocation3 + $0x48] sm:$0xff]  ;;  %1051 = vmatpush3.bf16.msra.mxu1 %v1050_v56 }
 0x36f   :  { %v1018_v17 = vpack.c.bf16 %v703_v39, %v702_v54  ;;  %1053 = vmatprep.subr.bf16.mxu1 %v1052_v11 }
 0x371   :  { %1019 = vmatpush3.bf16.msra.mxu0 %v1018_v17 }
 0x372   :  { %1021 = vmatprep.subr.bf16.mxu0 %v1020_v22  ;;  %1055 = vmatpush3.bf16.msra.mxu1 %v1054_v43 }
 0x373   :  { %1057 = vmatprep.subr.bf16.mxu1 %v1056_v26 }
 0x375   :  { %1023 = vmatpush3.bf16.msra.mxu0 %v1022_v42 }
 0x376   :  { %1025 = vmatprep.subr.bf16.mxu0 %v1024_v44  ;;  %1059 = vmatpush3.bf16.msra.mxu1 %v1058_v13 }
 0x377   :  { %1061 = vmatprep.subr.bf16.mxu1 %v1060_v50 }
 0x379   :  { %1027 = vmatpush3.bf16.msra.mxu0 %v1026_v29 }
 0x37a   :  { %1029 = vmatprep.subr.bf16.mxu0 %v1028_v20  ;;  %1063 = vmatpush3.bf16.msra.mxu1 %v1062_v21 }
 0x37d   :  { %1031 = vmatpush3.bf16.msra.mxu0 %v1030_v2 }
 0x3dc   :  { %v1081_v61 = vpop.permute.xlu1 %1080 }
 0x3dd   :  { %v1083_v25 = vunpack.i.h.bf16 %v1081_v61  ;;  %v1082_v4 = vunpack.i.l.bf16 %v1081_v61 }
 0x3df   :  { %v672_v9 = vsel %vm271_vm4, %v1082_v4, %v1083_v25 }
 0x3e0   :  { %v1086_v14 = vpop.permute.xlu1 %1085  ;;  %v674_v15 = vmax.f32 %v658_v37, %v672_v9 }
 0x3e1   :  { %v1088_v35 = vunpack.i.h.bf16 %v1086_v14  ;;  %v1087_v49 = vunpack.i.l.bf16 %v1086_v14 }
 0x3e3   :  { %v670_v27 = vsel %vm271_vm4, %v1087_v49, %v1088_v35  ;;  %v671_v28 = vsel %vm271_vm4, %v1083_v25, %v1087_v49  ;;  %v673_v51 = vsel %vm271_vm4, %v1088_v35, %v1082_v4 }
 0x3e4   :  { %v675_v46 = vmax.f32 %v659_v53, %v671_v28  ;;  %v676_v39 = vmax.f32 %v660_v31, %v670_v27  ;;  %v677_v55 = vmax.f32 %v661_v36, %v673_v51 }
 0x3e6   :  { %v1089_v54 = vpack.i.bf16 %v675_v46, %v674_v15  ;;  %v1094_v58 = vpack.i.bf16 %v677_v55, %v676_v39 }
 0x3e8   :  { %1090 = vrot.lane.b32.xlu1 %v1089_v54, %s1135_s26 }
 0x3ec   :  { %1095 = vrot.lane.b32.xlu1 %v1094_v58, %s1135_s26 }
 0x45a   :  { %v1091_v18 = vpop.permute.xlu1 %1090 }
 0x45b   :  { %v1093_v59 = vunpack.i.h.bf16 %v1091_v18  ;;  %v1092_v52 = vunpack.i.l.bf16 %v1091_v18 }
 0x45d   :  { %v688_v53 = vsel %vm357_vm5, %v1092_v52, %v1093_v59 }
 0x45e   :  { %v1096_v37 = vpop.permute.xlu1 %1095  ;;  %v690_v17 = vmax.f32 %v674_v15, %v688_v53 }
 0x45f   :  { %v1098_v62 = vunpack.i.h.bf16 %v1096_v37  ;;  %v1097_v30 = vunpack.i.l.bf16 %v1096_v37 }
 0x461   :  { %v686_v23 = vsel %vm357_vm5, %v1097_v30, %v1098_v62  ;;  %v687_v24 = vsel %vm357_vm5, %v1093_v59, %v1097_v30  ;;  %v689_v31 = vsel %vm357_vm5, %v1098_v62, %v1092_v52 }
 0x462   :  { %v692_v36 = vmax.f32 %v676_v39, %v686_v23  ;;  %v691_v38 = vmax.f32 %v675_v46, %v687_v24  ;;  %v693_v19 = vmax.f32 %v677_v55, %v689_v31 }
 0x464   :  { %822 = vmatprep.mubr.f32.mxu0 %v691_v38  ;;  %892 = vmatprep.mubr.f32.mxu1 %v693_v19 }
 0x465   :  { %823 = vmatmul.mubr.f32.vlgmr.msra.gmra.mrb[2].mxu0 %v690_v17  ;;  %893 = vmatmul.mubr.f32.vlgmr.msra.gmra.mrb[2].mxu1 %v692_v36 }
 0x538   :  { %v946_v56 = vpop.f32.mrb[2].mxu0  ;;  %v981_v22 = vpop.f32.mrb[2].mxu1 }
 0x539   :  { %v947_v63 = vpop.f32.mrb[3].mxu0  ;;  %v982_v40 = vpop.f32.mrb[3].mxu1 }
 0x53a   :  { %v948_v11 = vadd.f32 %v947_v63, %v946_v56  ;;  %v983_v41 = vadd.f32 %v982_v40, %v981_v22 }
 0x53c   :  { %v895_v5 = vadd.f32 %v983_v41, %v948_v11 }
 0x53e   :  { %898 = vst [vmem:[%s1613_s6] sm:$0xff] %v895_v5 }
 0x53f   :  { %903 = vsyncpa [#allocation4], 1 }

</bundles_post_ra>
